<compile_context>
chip_gen: v6e
topology: v6e:2x2x1
jax: 0.10.0
libtpu: 0.0.40
codegen_flags: <defaults>
</compile_context>

<pallas_src>
import functools

import jax
import jax.numpy as jnp
from jax import lax
from jax.experimental import pallas as pl
from jax.experimental.pallas import tpu as pltpu


def _cbam_kernel(x_ref, wfct_ref, bfc_ref, asp_ref, o_ref, *,
                 inv_hw, inv_c, elem_dtype):
    """One block of `bt` images per grid step.

    x_ref    : (bt, C, HW)   input images, spatially flattened (lane-dense)
    wfct_ref : (C, C)        transposed 1x1-conv (fc) weight: wfct[c, o] = w_fc[o, c]
    bfc_ref  : (1, C)        fc bias
    asp_ref  : (2*HW, HW)    stacked bf16 Toeplitz matrices of the KxK conv
                             (rows [0:HW) = mean channel, [HW:2HW) = max channel)
    o_ref    : (bt, C, HW)   output
    """
    x = x_ref[...]                                                  # (bt, C, HW)
    xf = x.astype(jnp.float32)

    # ---------------- Channel attention ----------------
    # AdaptiveAvgPool2d(1) == mean over the flattened spatial (lane) axis.
    avg = jnp.sum(xf, axis=-1) * inv_hw                             # (bt, C)
    # 1x1 conv over channels == batched matmul (+ bias) over the bt images.
    y = jnp.dot(avg, wfct_ref[...],
                preferred_element_type=jnp.float32) + bfc_ref[...]  # (bt, C)
    ca = jax.nn.sigmoid(y)                                          # (bt, C)
    x1 = x.astype(elem_dtype) * ca[:, :, None].astype(elem_dtype)   # (bt, C, HW)

    # ---------------- Spatial attention ----------------
    x1f = x1.astype(jnp.float32)
    m = jnp.sum(x1f, axis=1) * inv_c                                # (bt, HW) mean over C
    mx = jnp.max(x1f, axis=1)                                       # (bt, HW) max  over C
    # KxK zero-padded conv (2 in-ch -> 1 out-ch) as ONE fused bf16 MXU matmul
    # against the stacked Toeplitz matrix.
    lhs = jnp.concatenate([m, mx], axis=-1).astype(jnp.bfloat16)    # (bt, 2*HW)
    conv = jnp.dot(lhs, asp_ref[...],
                   preferred_element_type=jnp.float32)              # (bt, HW)
    sa = jax.nn.sigmoid(conv)                                       # (bt, HW)

    # Lane-dense full-block store.
    o_ref[...] = (x1 * sa[:, None, :].astype(elem_dtype)).astype(o_ref.dtype)


def _spatial_conv_matrices(w_sp, H, W, kernel_size, pad):
    """Fold the KxK zero-padded conv into per-channel (H*W, H*W) matrices.

    A[c, q, p], with q = i_in*W + j_in and p = i_out*W + j_out, equals
    w_sp[c, i_in - i_out + pad, j_in - j_out + pad] when both offsets lie in
    [0, K), else 0.  Then conv(cat(mean, max)) = mean_flat @ A[0] + max_flat @ A[1]
    = concat([mean_flat, max_flat]) @ vstack([A[0], A[1]]).
    """
    K = kernel_size
    iq = jnp.arange(H).reshape(H, 1, 1, 1)
    jq = jnp.arange(W).reshape(1, W, 1, 1)
    ip = jnp.arange(H).reshape(1, 1, H, 1)
    jp = jnp.arange(W).reshape(1, 1, 1, W)
    dy = iq - ip + pad                                        # (H, 1, H, 1)
    dx = jq - jp + pad                                        # (1, W, 1, W)
    valid = (dy >= 0) & (dy < K) & (dx >= 0) & (dx < K)       # (H, W, H, W)
    dyc = jnp.clip(dy, 0, K - 1)
    dxc = jnp.clip(dx, 0, K - 1)
    taps = w_sp[:, dyc, dxc]                                  # (2, H, W, H, W)
    a = jnp.where(valid[None], taps, 0.0).astype(jnp.float32)
    return a.reshape(2, H * W, H * W)


def _pick_batch_tile(B, per_image_bytes, target_block_bytes, cap=256, min_steps=2):
    """Largest bt (<= cap) whose block fits the budget, preferring >= min_steps
    grid steps so v7x's 2 TensorCores both get work (harmless on 1-TC chips)."""
    bt = max(1, min(B, cap, target_block_bytes // max(per_image_bytes, 1)))
    if B >= min_steps and pl.cdiv(B, bt) < min_steps:
        bt = pl.cdiv(B, min_steps)
    return int(bt)


def cbam_pallas(x, w_fc, b_fc, w_sp, kernel_size=7):
    """x: (B, C, H, W); w_fc: (C, C); b_fc: (C,); w_sp: (2, K, K)."""
    assert kernel_size in (3, 7)
    pad = 3 if kernel_size == 7 else 1
    B, C, H, W = x.shape
    HW = H * W

    # Lane-dense layout: flatten the spatial dims so the minor dim is H*W.
    x_flat = x.reshape(B, C, HW)
    # Stacked bf16 Toeplitz matrix for the fused spatial-conv matmul.
    a_sp = _spatial_conv_matrices(w_sp.astype(jnp.float32), H, W, kernel_size, pad)
    a_sp = a_sp.reshape(2 * HW, HW).astype(jnp.bfloat16)
    wfc_t = w_fc.astype(jnp.float32).T                        # (C_in, C_out)
    bias = b_fc.astype(jnp.float32).reshape(1, C)

    # ---- Per-generation VMEM budget (with headroom) & batch tile selection ----
    try:
        phys_vmem = int(pltpu.get_tpu_info().vmem_capacity_bytes)
    except Exception:
        phys_vmem = 64 << 20                  # conservative (v7x-sized) fallback
    vmem_cap = (phys_vmem * 3) // 4           # ~48 MiB on v7x, ~96 MiB on v5e/v6e

    itemsize = jnp.dtype(x.dtype).itemsize
    weights_bytes = a_sp.size * 2 + (wfc_t.size + bias.size) * 4
    avail = max(vmem_cap - 2 * weights_bytes - (8 << 20), 4 << 20)
    target_block = min(avail // 8, 8 << 20)   # double-buffered x/out + live temps
    per_image = C * HW * itemsize
    bt = _pick_batch_tile(B, per_image, target_block)
    num_blocks = pl.cdiv(B, bt)
    block_bytes = bt * per_image

    # TODO(synk): if a single image (C*HW) already exceeds the block budget, or
    # 2*HW^2 bf16 no longer fits comfortably (HW >~ 1024 on v7x, ~2048 on
    # v5e/v6e), switch the spatial conv to a banded / H-tiled formulation with a
    # K//2 halo instead of the dense Toeplitz matmul.

    est = 4 * block_bytes + 4 * bt * C * HW * 4 + 2 * weights_bytes + (8 << 20)
    vmem_limit = int(min(max(est, 32 << 20), vmem_cap))

    # bf16-native elementwise path for bf16 inputs (v6e/v7x); f32 otherwise.
    elem_dtype = jnp.bfloat16 if x.dtype == jnp.bfloat16 else jnp.float32
    kern = functools.partial(_cbam_kernel, inv_hw=1.0 / float(HW),
                             inv_c=1.0 / float(C), elem_dtype=elem_dtype)

    def _call(single_buffer_invariants):
        inv_kwargs = ({"pipeline_mode": pl.Buffered(1)}
                      if single_buffer_invariants else {})
        in_specs = [
            pl.BlockSpec((bt, C, HW), lambda i: (i, 0, 0)),              # x
            pl.BlockSpec((C, C), lambda i: (0, 0), **inv_kwargs),        # fc weight^T
            pl.BlockSpec((1, C), lambda i: (0, 0), **inv_kwargs),        # fc bias
            pl.BlockSpec((2 * HW, HW), lambda i: (0, 0), **inv_kwargs),  # Toeplitz
        ]
        return pl.pallas_call(
            kern,
            out_shape=jax.ShapeDtypeStruct((B, C, HW), x.dtype),
            grid=(num_blocks,),
            in_specs=in_specs,
            out_specs=pl.BlockSpec((bt, C, HW), lambda i: (i, 0, 0)),
            compiler_params=pltpu.CompilerParams(
                dimension_semantics=("parallel",),
                vmem_limit_bytes=vmem_limit,
            ),
        )(x_flat, wfc_t, bias, a_sp)

    try:
        out_flat = _call(True)
    except Exception:
        # pl.Buffered(1) single-buffering not supported by this jax version;
        # fall back to default double-buffering of the grid-invariant inputs.
        out_flat = _call(False)

    return out_flat.reshape(B, C, H, W)


def cbam_reference(x, w_fc, b_fc, w_sp, kernel_size=7):
    """Pure-JAX reference matching the PyTorch forward exactly (all f32)."""
    pad = 3 if kernel_size == 7 else 1
    B, C, H, W = x.shape
    # Channel attention
    avg = jnp.mean(x, axis=(2, 3), keepdims=True)                          # (B,C,1,1)
    y = jnp.einsum('oc,bcij->boij', w_fc, avg) + b_fc.reshape(1, C, 1, 1)
    x1 = x * jax.nn.sigmoid(y)
    # Spatial attention
    cat = jnp.concatenate(
        [jnp.mean(x1, axis=1, keepdims=True), jnp.max(x1, axis=1, keepdims=True)],
        axis=1)                                                            # (B,2,H,W)
    conv = lax.conv_general_dilated(
        cat, w_sp.reshape(1, 2, kernel_size, kernel_size),
        window_strides=(1, 1), padding=[(pad, pad), (pad, pad)],
        dimension_numbers=('NCHW', 'OIHW', 'NCHW'))
    return x1 * jax.nn.sigmoid(conv)


if __name__ == "__main__":
    B, C, H, W = 2, 4, 16, 16
    K = 7

    key = jax.random.PRNGKey(0)
    kx, kw1, kb1, kw2 = jax.random.split(key, 4)

    x = jax.random.normal(kx, (B, C, H, W), dtype=jnp.float32)
    # Shapes match nn.Conv2d(C, C, 1, bias=True) and nn.Conv2d(2, 1, K, padding=K//2, bias=False).
    w_fc = jax.random.normal(kw1, (C, C), dtype=jnp.float32) * 0.1
    b_fc = jax.random.normal(kb1, (C,), dtype=jnp.float32) * 0.1
    w_sp = jax.random.normal(kw2, (2, K, K), dtype=jnp.float32) * 0.1

    out = cbam_pallas(x, w_fc, b_fc, w_sp, kernel_size=K)
    out = jax.block_until_ready(out)

    ref = cbam_reference(x, w_fc, b_fc, w_sp, kernel_size=K)
    assert out.shape == (B, C, H, W)
    max_err = jnp.max(jnp.abs(out - ref))
    # Tolerance relaxed vs a pure-f32 kernel: the spatial conv runs the MXU in
    # bf16 (Toeplitz matrix + mean/max LHS), which is pre-sigmoid so the end
    # error stays at the few-1e-3 level.
    assert jnp.allclose(out, ref, rtol=2e-2, atol=2e-2), f"max abs err = {max_err}"

    print("KERNEL_OK")
</pallas_src>

<mosaic_0001>
module attributes {stable_mosaic.version = 11 : i64} {
  func.func @_cbam_kernel(%arg0: i32, %arg1: memref<1x4x256xf32, #tpu.memory_space<vmem>>, %arg2: memref<4x4xf32, #tpu.memory_space<vmem>>, %arg3: memref<1x4xf32, #tpu.memory_space<vmem>>, %arg4: memref<512x256xbf16, #tpu.memory_space<vmem>>, %arg5: memref<1x4x256xf32, #tpu.memory_space<vmem>>) attributes {dimension_semantics = [#tpu.dimension_semantics<parallel>], iteration_bounds = array<i64: 2>, scalar_prefetch = 0 : i64, scratch_operands = 0 : i64, tpu.core_type = #tpu.core_type<tc>, window_params = [{transform_indices = @transform_0, window_bounds = array<i64: 1, 4, 256>}, {pipeline_mode = #tpu.pipeline_mode<synchronous>, transform_indices = @transform_1, window_bounds = array<i64: 4, 4>}, {pipeline_mode = #tpu.pipeline_mode<synchronous>, transform_indices = @transform_2, window_bounds = array<i64: 1, 4>}, {pipeline_mode = #tpu.pipeline_mode<synchronous>, transform_indices = @transform_3, window_bounds = array<i64: 512, 256>}, {transform_indices = @transform_4, window_bounds = array<i64: 1, 4, 256>}]} {
    %c0 = arith.constant 0 : index
    %c0_0 = arith.constant 0 : index
    %c0_1 = arith.constant 0 : index
    %0 = vector.load %arg1[%c0, %c0_0, %c0_1] : memref<1x4x256xf32, #tpu.memory_space<vmem>>, vector<1x4x256xf32>
    %cst = arith.constant dense<0.000000e+00> : vector<1x4xf32>
    %1 = vector.multi_reduction <add>, %0, %cst [2] : vector<1x4x256xf32> to vector<1x4xf32>
    %cst_2 = arith.constant 3.906250e-03 : f32
    %2 = vector.broadcast %cst_2 : f32 to vector<1x4xf32>
    %3 = arith.mulf %1, %2 : vector<1x4xf32>
    %c0_3 = arith.constant 0 : index
    %c0_4 = arith.constant 0 : index
    %4 = vector.load %arg2[%c0_3, %c0_4] : memref<4x4xf32, #tpu.memory_space<vmem>>, vector<4x4xf32>
    %cst_5 = arith.constant dense<0.000000e+00> : vector<1x4xf32>
    %5 = tpu.matmul %3, %4, %cst_5 {dimension_numbers = #tpu.dot_dimension_numbers<[1], [0], [0], [1], [0, 0, 1, 1], [], []>} : vector<1x4xf32>, vector<4x4xf32>, vector<1x4xf32> -> vector<1x4xf32>
    %c0_6 = arith.constant 0 : index
    %c0_7 = arith.constant 0 : index
    %6 = vector.load %arg3[%c0_6, %c0_7] : memref<1x4xf32, #tpu.memory_space<vmem>>, vector<1x4xf32>
    %7 = arith.addf %5, %6 : vector<1x4xf32>
    %8 = arith.negf %7 : vector<1x4xf32>
    %9 = math.exp %8 : vector<1x4xf32>
    %cst_8 = arith.constant 1.000000e+00 : f32
    %10 = vector.broadcast %cst_8 : f32 to vector<1x4xf32>
    %11 = arith.addf %10, %9 : vector<1x4xf32>
    %12 = arith.divf %10, %11 : vector<1x4xf32>
    %13 = vector.shape_cast %12 : vector<1x4xf32> to vector<1x4x1xf32>
    %14 = vector.broadcast %13 : vector<1x4x1xf32> to vector<1x4x256xf32>
    %15 = arith.mulf %0, %14 : vector<1x4x256xf32>
    %cst_9 = arith.constant dense<0.000000e+00> : vector<1x256xf32>
    %16 = vector.multi_reduction <add>, %15, %cst_9 [1] : vector<1x4x256xf32> to vector<1x256xf32>
    %cst_10 = arith.constant 2.500000e-01 : f32
    %17 = vector.broadcast %cst_10 : f32 to vector<1x256xf32>
    %18 = arith.mulf %16, %17 : vector<1x256xf32>
    %cst_11 = arith.constant dense<0xFF800000> : vector<1x256xf32>
    %19 = vector.multi_reduction <maximumf>, %15, %cst_11 [1] : vector<1x4x256xf32> to vector<1x256xf32>
    %20 = tpu.concatenate %18, %19 in 1 : vector<1x256xf32>, vector<1x256xf32> -> vector<1x512xf32>
    %21 = arith.truncf %20 : vector<1x512xf32> to vector<1x512xbf16>
    %c0_12 = arith.constant 0 : index
    %c0_13 = arith.constant 0 : index
    %22 = vector.load %arg4[%c0_12, %c0_13] : memref<512x256xbf16, #tpu.memory_space<vmem>>, vector<512x256xbf16>
    %cst_14 = arith.constant dense<0.000000e+00> : vector<1x256xf32>
    %23 = tpu.matmul %21, %22, %cst_14 {dimension_numbers = #tpu.dot_dimension_numbers<[1], [0], [0], [1], [0, 0, 1, 1], [], []>} : vector<1x512xbf16>, vector<512x256xbf16>, vector<1x256xf32> -> vector<1x256xf32>
    %24 = arith.negf %23 : vector<1x256xf32>
    %25 = math.exp %24 : vector<1x256xf32>
    %cst_15 = arith.constant 1.000000e+00 : f32
    %26 = vector.broadcast %cst_15 : f32 to vector<1x256xf32>
    %27 = arith.addf %26, %25 : vector<1x256xf32>
    %28 = arith.divf %26, %27 : vector<1x256xf32>
    %29 = vector.shape_cast %28 : vector<1x256xf32> to vector<1x1x256xf32>
    %30 = vector.broadcast %29 : vector<1x1x256xf32> to vector<1x4x256xf32>
    %31 = arith.mulf %15, %30 : vector<1x4x256xf32>
    %c0_16 = arith.constant 0 : index
    %c0_17 = arith.constant 0 : index
    %c0_18 = arith.constant 0 : index
    %32 = vector.load %arg5[%c0_16, %c0_17, %c0_18] : memref<1x4x256xf32, #tpu.memory_space<vmem>>, vector<1x4x256xf32>
    tpu.vector_store %arg5[%c0_16, %c0_17, %c0_18], %31 {strides = array<i32>} : memref<1x4x256xf32, #tpu.memory_space<vmem>>, vector<1x4x256xf32>,
    return
  }
  func.func @transform_0(%arg0: i32) -> (i32, i32, i32) {
    %c0_i32 = arith.constant 0 : i32
    %c0_i32_0 = arith.constant 0 : i32
    %c0_i32_1 = arith.constant 0 : i32
    return %arg0, %c0_i32, %c0_i32_0 : i32, i32, i32
  }
  func.func @transform_1(%arg0: i32) -> (i32, i32) {
    %c0_i32 = arith.constant 0 : i32
    %c0_i32_0 = arith.constant 0 : i32
    %c0_i32_1 = arith.constant 0 : i32
    return %c0_i32, %c0_i32_0 : i32, i32
  }
  func.func @transform_2(%arg0: i32) -> (i32, i32) {
    %c0_i32 = arith.constant 0 : i32
    %c0_i32_0 = arith.constant 0 : i32
    %c0_i32_1 = arith.constant 0 : i32
    return %c0_i32, %c0_i32_0 : i32, i32
  }
  func.func @transform_3(%arg0: i32) -> (i32, i32) {
    %c0_i32 = arith.constant 0 : i32
    %c0_i32_0 = arith.constant 0 : i32
    %c0_i32_1 = arith.constant 0 : i32
    return %c0_i32, %c0_i32_0 : i32, i32
  }
  func.func @transform_4(%arg0: i32) -> (i32, i32, i32) {
    %c0_i32 = arith.constant 0 : i32
    %c0_i32_0 = arith.constant 0 : i32
    %c0_i32_1 = arith.constant 0 : i32
    return %arg0, %c0_i32, %c0_i32_0 : i32, i32, i32
  }
}

module attributes {stable_mosaic.version = 11 : i64} {
  func.func @_cbam_kernel(%arg0: i32, %arg1: memref<1x4x256xf32, #tpu.memory_space<vmem>>, %arg2: memref<4x4xf32, #tpu.memory_space<vmem>>, %arg3: memref<1x4xf32, #tpu.memory_space<vmem>>, %arg4: memref<512x256xbf16, #tpu.memory_space<vmem>>, %arg5: memref<1x4x256xf32, #tpu.memory_space<vmem>>) attributes {dimension_semantics = [#tpu.dimension_semantics<parallel>], iteration_bounds = array<i64: 2>, scalar_prefetch = 0 : i64, scratch_operands = 0 : i64, tpu.core_type = #tpu.core_type<tc>, window_params = [{transform_indices = @transform_0, window_bounds = array<i64: 1, 4, 256>}, {pipeline_mode = #tpu.pipeline_mode<synchronous>, transform_indices = @transform_1, window_bounds = array<i64: 4, 4>}, {pipeline_mode = #tpu.pipeline_mode<synchronous>, transform_indices = @transform_2, window_bounds = array<i64: 1, 4>}, {pipeline_mode = #tpu.pipeline_mode<synchronous>, transform_indices = @transform_3, window_bounds = array<i64: 512, 256>}, {transform_indices = @transform_4, window_bounds = array<i64: 1, 4, 256>}]} {
    %c0 = arith.constant 0 : index
    %c0_0 = arith.constant 0 : index
    %c0_1 = arith.constant 0 : index
    %0 = vector.load %arg1[%c0, %c0_0, %c0_1] : memref<1x4x256xf32, #tpu.memory_space<vmem>>, vector<1x4x256xf32>
    %cst = arith.constant dense<0.000000e+00> : vector<1x4xf32>
    %1 = vector.multi_reduction <add>, %0, %cst [2] : vector<1x4x256xf32> to vector<1x4xf32>
    %cst_2 = arith.constant 3.906250e-03 : f32
    %2 = vector.broadcast %cst_2 : f32 to vector<1x4xf32>
    %3 = arith.mulf %1, %2 : vector<1x4xf32>
    %c0_3 = arith.constant 0 : index
    %c0_4 = arith.constant 0 : index
    %4 = vector.load %arg2[%c0_3, %c0_4] : memref<4x4xf32, #tpu.memory_space<vmem>>, vector<4x4xf32>
    %cst_5 = arith.constant dense<0.000000e+00> : vector<1x4xf32>
    %5 = tpu.matmul %3, %4, %cst_5 {dimension_numbers = #tpu.dot_dimension_numbers<[1], [0], [0], [1], [0, 0, 1, 1], [], []>} : vector<1x4xf32>, vector<4x4xf32>, vector<1x4xf32> -> vector<1x4xf32>
    %c0_6 = arith.constant 0 : index
    %c0_7 = arith.constant 0 : index
    %6 = vector.load %arg3[%c0_6, %c0_7] : memref<1x4xf32, #tpu.memory_space<vmem>>, vector<1x4xf32>
    %7 = arith.addf %5, %6 : vector<1x4xf32>
    %8 = arith.negf %7 : vector<1x4xf32>
    %9 = math.exp %8 : vector<1x4xf32>
    %cst_8 = arith.constant 1.000000e+00 : f32
    %10 = vector.broadcast %cst_8 : f32 to vector<1x4xf32>
    %11 = arith.addf %10, %9 : vector<1x4xf32>
    %12 = arith.divf %10, %11 : vector<1x4xf32>
    %13 = vector.shape_cast %12 : vector<1x4xf32> to vector<1x4x1xf32>
    %14 = vector.broadcast %13 : vector<1x4x1xf32> to vector<1x4x256xf32>
    %15 = arith.mulf %0, %14 : vector<1x4x256xf32>
    %cst_9 = arith.constant dense<0.000000e+00> : vector<1x256xf32>
    %16 = vector.multi_reduction <add>, %15, %cst_9 [1] : vector<1x4x256xf32> to vector<1x256xf32>
    %cst_10 = arith.constant 2.500000e-01 : f32
    %17 = vector.broadcast %cst_10 : f32 to vector<1x256xf32>
    %18 = arith.mulf %16, %17 : vector<1x256xf32>
    %cst_11 = arith.constant dense<0xFF800000> : vector<1x256xf32>
    %19 = vector.multi_reduction <maximumf>, %15, %cst_11 [1] : vector<1x4x256xf32> to vector<1x256xf32>
    %20 = tpu.concatenate %18, %19 in 1 : vector<1x256xf32>, vector<1x256xf32> -> vector<1x512xf32>
    %21 = arith.truncf %20 : vector<1x512xf32> to vector<1x512xbf16>
    %c0_12 = arith.constant 0 : index
    %c0_13 = arith.constant 0 : index
    %22 = vector.load %arg4[%c0_12, %c0_13] : memref<512x256xbf16, #tpu.memory_space<vmem>>, vector<512x256xbf16>
    %cst_14 = arith.constant dense<0.000000e+00> : vector<1x256xf32>
    %23 = tpu.matmul %21, %22, %cst_14 {dimension_numbers = #tpu.dot_dimension_numbers<[1], [0], [0], [1], [0, 0, 1, 1], [], []>} : vector<1x512xbf16>, vector<512x256xbf16>, vector<1x256xf32> -> vector<1x256xf32>
    %24 = arith.negf %23 : vector<1x256xf32>
    %25 = math.exp %24 : vector<1x256xf32>
    %cst_15 = arith.constant 1.000000e+00 : f32
    %26 = vector.broadcast %cst_15 : f32 to vector<1x256xf32>
    %27 = arith.addf %26, %25 : vector<1x256xf32>
    %28 = arith.divf %26, %27 : vector<1x256xf32>
    %29 = vector.shape_cast %28 : vector<1x256xf32> to vector<1x1x256xf32>
    %30 = vector.broadcast %29 : vector<1x1x256xf32> to vector<1x4x256xf32>
    %31 = arith.mulf %15, %30 : vector<1x4x256xf32>
    %c0_16 = arith.constant 0 : index
    %c0_17 = arith.constant 0 : index
    %c0_18 = arith.constant 0 : index
    %32 = vector.load %arg5[%c0_16, %c0_17, %c0_18] : memref<1x4x256xf32, #tpu.memory_space<vmem>>, vector<1x4x256xf32>
    tpu.vector_store %arg5[%c0_16, %c0_17, %c0_18], %31 {strides = array<i32>} : memref<1x4x256xf32, #tpu.memory_space<vmem>>, vector<1x4x256xf32>,
    return
  }
  func.func @transform_0(%arg0: i32) -> (i32, i32, i32) {
    %c0_i32 = arith.constant 0 : i32
    %c0_i32_0 = arith.constant 0 : i32
    %c0_i32_1 = arith.constant 0 : i32
    return %arg0, %c0_i32, %c0_i32_0 : i32, i32, i32
  }
  func.func @transform_1(%arg0: i32) -> (i32, i32) {
    %c0_i32 = arith.constant 0 : i32
    %c0_i32_0 = arith.constant 0 : i32
    %c0_i32_1 = arith.constant 0 : i32
    return %c0_i32, %c0_i32_0 : i32, i32
  }
  func.func @transform_2(%arg0: i32) -> (i32, i32) {
    %c0_i32 = arith.constant 0 : i32
    %c0_i32_0 = arith.constant 0 : i32
    %c0_i32_1 = arith.constant 0 : i32
    return %c0_i32, %c0_i32_0 : i32, i32
  }
  func.func @transform_3(%arg0: i32) -> (i32, i32) {
    %c0_i32 = arith.constant 0 : i32
    %c0_i32_0 = arith.constant 0 : i32
    %c0_i32_1 = arith.constant 0 : i32
    return %c0_i32, %c0_i32_0 : i32, i32
  }
  func.func @transform_4(%arg0: i32) -> (i32, i32, i32) {
    %c0_i32 = arith.constant 0 : i32
    %c0_i32_0 = arith.constant 0 : i32
    %c0_i32_1 = arith.constant 0 : i32
    return %arg0, %c0_i32, %c0_i32_0 : i32, i32, i32
  }
}

</mosaic_0001>

<bundles_post_ra>
// kernel: tpu_custom_call.1
= control target key start
LH: loop header
LB: loop body
LE: loop exit
PB: predicated region body
PF: predicated region fallthrough
CT: control target
= control target key end

     0   :  { %9 = vsyncpa [#allocation3], 0  ;;  %s1656_s0 = inlined_call_operand.hbm [shape: f32[2,4,256], index: 0, kind: input, shape index: {}]   ;;  %s1657_s1 = inlined_call_operand.hbm [shape: f32[4,4], index: 1, kind: input, shape index: {}]   ;;  %s1658_s2 = inlined_call_operand.vmem [shape: f32[1,4], index: 2, kind: input, shape index: {}]   ;;  %s1659_s3 = inlined_call_operand.hbm [shape: bf16[512,256], index: 3, kind: input, shape index: {}]   ;;  %s1660_s4 = inlined_call_operand.hbm [shape: f32[2,4,256], index: 4, kind: output, shape index: {}]  }
   0x1   :  { %11 = vsyncpa [#allocation3 + $0x1], 0 }
   0x2   :  { %12 = vsyncpa [#allocation6], 0 }
   0x3   :  { %13 = vsyncpa [#allocation4], 0 }
   0x4   :  { %15 = vsyncpa [#allocation4 + $0x1], 0  ;;  %s1454_s15 = smov 0   ;;  %s1456_s16 = smov 0  }
   0x5   :  { %s1458_s17 = smov 0   ;;  %s1460_s18 = smov 0  }
   0x6 LB: > { %s1475_s19 = sadd.s32 4294967295, %s1418_s18   ;;  %s993_s20 = sadd.s32 4294967294, %s1418_s18   ;;  %s1418_s18 = sphi %s1460_s18, %s1682_s18   ;;  %s1414_s17 = sphi %s1458_s17, %s1681_s17   ;;  %s1410_s16 = sphi %s1456_s16, %s1680_s16   ;;  %s1406_s15 = sphi %s1454_s15, %s1679_s15  }
   0x7   : > { %p41_p0 = scmp.ne.s32.totalorder %s1410_s16, %s1406_s15  ;;  %p1661_p1 = scmp.eq.s32.totalorder %s1475_s19, 0 }
   0x8   : > { %p134_p3 = scmp.eq.s32.totalorder %s993_s20, 1  ;;  %p994_p5 = scmp.ge.s32.totalorder %s1418_s18, 1 }
   0x9   : > { %p1484_p4 = por %p1661_p1, %p41_p0  ;;  %p141_p7 = scmp.lt.s32.totalorder %s1418_s18, 3 }
   0xa   : > { %p1489_p6 = por %p134_p3, %p41_p0  ;;  %s1420_s24 = smov [#allocation5]  }
   0xb   : > { %s1665_s21 = scalar_select %p1484_p4, 1, 0 }
   0xc   : > { %s1666_s22 = scalar_select %p1489_p6, 1, 0 }
   0xd   : > { %p1494_p8 = pnand %p994_p5, %p141_p7  ;;  %s154_s25 = sshll.u32 %s1420_s24, 4  ;;  %s155_s25 = int_to_ptr.vmem [resolvable:$true] %s154_s25 }
   0xe   : > { %s1421_s26 = smov [#allocation7]   ;;  %s1281_s29 = scalar_lea.vmem %s155_s25, 64 }
   0xf   : > { %s1667_s23 = scalar_select %p1494_p8, 1, 0 }
  0x10   : > { %p1101_p10 = pneg %p1494_p8  ;;  %s167_s27 = sshll.u32 %s1421_s26, 4  ;;  %s168_s27 = int_to_ptr.vmem [resolvable:$true] %s167_s27 }
  0x11   : > { %p1282_p13 = scmp.ne.s32.totalorder %s155_s25, %s1281_s29  ;;  %p1289_p5 = scmp.lt.s32.totalorder %s155_s25, %s155_s25 }
  0x12   : > { %p1503_p11 = pnand %p1101_p10, %p1661_p1  ;;  %p1290_p7 = scmp.lt.s32.totalorder %s1281_s29, %s1281_s29 }
  0x14   : > { %p1272_p12 = pneg %p1503_p11  ;;  %p1291_p9 = por %p1290_p7, %p1289_p5 }
  0x16   : > { %p1284_p0 = pnand %p1282_p13, %p1272_p12 }
  0x18   : > { %p1285_p3 = pneg %p1284_p0 }
  0x1a   : > { %p1292_p2 = pnand %p1291_p9, %p1285_p3 }
  0x1c   : > { %1295 = shalt.err (!%p1292_p2)
}
  0x1d   : > { %1104 = dma.hbm_to_vmem [thread:$0]  (!%p1503_p11), %s1657_s1, 64, %s155_s25, [#allocation6]  }
  0x1e   : > { %s1307_s6 = scalar_lea.vmem %s168_s27, 8192  ;;  %p1315_p13 = scmp.lt.s32.totalorder %s168_s27, %s168_s27 }
  0x1f   : > { %p1308_p10 = scmp.ne.s32.totalorder %s168_s27, %s1307_s6  ;;  %p1316_p0 = scmp.lt.s32.totalorder %s1307_s6, %s1307_s6 }
  0x21   : > { %p1310_p1 = pnand %p1308_p10, %p1272_p12  ;;  %p1317_p4 = por %p1316_p0, %p1315_p13 }
  0x23   : > { %p1311_p6 = pneg %p1310_p1 }
  0x25   : > { %p1318_p8 = pnand %p1317_p4, %p1311_p6 }
  0x27   : > { %1321 = shalt.err (!%p1318_p8)
}
  0x28   : > { %s1422_s7 = smov 128   ;;  %s1423_s8 = smov 8  }
  0x29   : > { %1107 = dma.hbm_to_vmem [thread:$0]  (!%p1503_p11), %s1659_s3, 8192, %s168_s27, [#allocation6], %s1422_s7, %s1422_s7, %s1423_s8  }
  0x2a   : > { %s1526_s11 = sadd.s32 1, %s1418_s18   ;;  %s28_s12 = sadd.s32 1, %s1414_s17 }
  0x2b   : > { %s25_s13 = ssub.s32 %s1418_s18, %s1526_s11  ;;  %p35_p1 = scmp.ne.s32.totalorder %s1414_s17, %s1410_s16 }
  0x2c   : > { %p26_p2 = scmp.eq.s32.totalorder %s25_s13, 0  ;;  %p36_p4 = scmp.eq.s32.totalorder %s1418_s18, 0 }
  0x2d   : > { %p1669_p6 = scmp.eq.s32.totalorder %s1475_s19, 1  ;;  %p1118_p9 = scmp.lt.s32.totalorder %s1418_s18, 2 }
  0x2e   : > { %s1542_s20 = scalar_select %p26_p2, %s1414_s17, %s28_s12  }
  0x2f   : > { %p1536_p8 = por %p1669_p6, %p35_p1  ;;  %p37_p12 = por %p36_p4, %p35_p1 }
  0x30   : > { %s181_s24 = sand.u32 1, %s1414_s17   ;;  %s1080_s26 = sshll.u32 %s1418_s18, 7 }
  0x31   : > { %s1670_s14 = scalar_select %p1536_p8, 1, 0 }
  0x32   : > { %s998_s25 = sshll.u32 %s181_s24, 3  ;;  %s1549_s29 = scalar_lea.hbm %s1656_s0, %s1080_s26 }
  0x33   : > { %s185_s30 = scalar_lea.vmem [#allocation2], %s998_s25  ;;  %p1551_p11 = pnand %p1118_p9, %p37_p12 }
  0x34   : > { %s193_s5 = sshll.u32 %s185_s30, 4  ;;  %s182_s7 = scalar_lea.sflag [#allocation3], %s181_s24  ;;  %s194_s5 = int_to_ptr.vmem [resolvable:$true] %s193_s5 }
  0x35   : > { %s1322_s8 = scalar_lea.hbm %s1549_s29, 128  ;;  %p1324_p5 = pneg %p1551_p11 }
  0x36   : > { %p1323_p3 = scmp.ne.s32.totalorder %s1549_s29, %s1322_s8  ;;  %s1327_s12 = scalar_lea.hbm %s1656_s0, 256 }
  0x37   : > { %p1328_p13 = scmp.lt.s32.totalorder %s1549_s29, %s1656_s0  ;;  %p1329_p0 = scmp.lt.s32.totalorder %s1327_s12, %s1322_s8 }
  0x38   : > { %p1325_p7 = pnand %p1324_p5, %p1323_p3 }
  0x39   : > { %p1330_p1 = por %p1329_p0, %p1328_p13 }
  0x3a   : > { %p1326_p10 = pneg %p1325_p7 }
  0x3c   : > { %p1331_p2 = pnand %p1330_p1, %p1326_p10 }
  0x3e   : > { %1334 = shalt.err (!%p1331_p2)
}
  0x3f   : > { %s1335_s26 = scalar_lea.vmem %s194_s5, 128  ;;  %s1424_s24 = smov [#allocation2]  }
  0x40   : > { %p1336_p4 = scmp.ne.s32.totalorder %s194_s5, %s1335_s26  ;;  %s1340_s27 = sshll.u32 %s1424_s24, 4  ;;  %s1341_s27 = int_to_ptr.vmem [resolvable:$false] %s1340_s27 }
  0x41   : > { %s1342_s28 = scalar_lea.vmem %s1341_s27, 256  ;;  %p1343_p12 = scmp.lt.s32.totalorder %s194_s5, %s1341_s27 }
  0x42   : > { %p1338_p6 = pnand %p1336_p4, %p1324_p5  ;;  %p1344_p3 = scmp.lt.s32.totalorder %s1342_s28, %s1335_s26 }
  0x44   : > { %p1339_p9 = pneg %p1338_p6  ;;  %p1345_p7 = por %p1344_p3, %p1343_p12 }
  0x46   : > { %p1346_p8 = pnand %p1345_p7, %p1339_p9 }
  0x48   : > { %1349 = shalt.err (!%p1346_p8)
}
  0x49   : > { %1111 = dma.hbm_to_vmem [thread:$0]  (!%p1551_p11), %s1549_s29, 128, %s194_s5, %s182_s7  }
  0x4a   : > { %p1672_p10 = scmp.ne.s32.totalorder %s1667_s23, 0 }
  0x4b   : > { %s1572_s30 = sand.u32 (!%p1672_p10), 1, %s1410_s16   ;;  %p1673_p5 = scmp.ne.s32.totalorder (!%p1672_p10), %s1665_s21, 0 }
  0x4c   : > { %202 = sbr.rel (%p1672_p10) target bundleno = 849 (0x351), region = 36  ;;  %s1002_s8 = sshll.u32 (!%p1672_p10), %s1572_s30, 3 }
  0x4d   : > { %s205_s9 = scalar_lea.sflag (!%p1672_p10), [#allocation3], %s1572_s30  ;;  %s208_s10 = scalar_lea.vmem (!%p1672_p10), [#allocation2], %s1002_s8 }
  0x51   : > { %1393 = dma.done.wait (%p1673_p5), %s205_s9, 128  }
  0x52   : > { %1395 = vsyncadd (%p1673_p5), %s205_s9, 4294967168  ;;  %p1674_p8 = scmp.eq.s32.totalorder %s1475_s19, 0 }
  0x54   : > { %1397 = dma.done.wait (%p1674_p8), [#allocation6], 8256   ;;  %p1675_p11 = pmov %p1674_p8 }
  0x55   : > { %vm245_vm0 = vcmask 1043456   ;;  %v1586_v0 = vld [vmem:[%s208_s10] sm:$0xff]  ;;  %v1425_v5 = vmov 0.0   ;;  %v252_v6 = vld [vmem:[#allocation5] sm:$0xf]  ;;  %vm1426_vm1 = vmmov 0   ;;  %v255_v7 = vlaneseq }
  0x56   : > { %1399 = vsyncadd (%p1675_p11), [#allocation6], 4294959040  ;;  %v243_v1 = vcombine.high %v1586_v0, %v1586_v0  ;;  %v246_v2 = vsel %vm245_vm0, %v1586_v0, 0.0  ;;  %1084 = vmatprep.subr.mxu0 %v1425_v5  ;;  %1086 = vmatprep.mubr.msk.f32.mxu0 %vm1426_vm1, %v1425_v5  ;;  %vm261_vm2 = vcmask 31744   ;;  %v1162_v14 = vld [vmem:[#allocation7 + $0x170] ss:$8 sps:$4 sm:$0xff]  }
  0x57   : > { %1085 = vmatpush3.msk.msra.mxu0 %vm245_vm0, %v252_v6  ;;  %v256_v8 = vand.u32 127, %v255_v7  ;;  %v1594_v9 = vshrl.u32 %v255_v7, 7  ;;  %v1164_v15 = vld [vmem:[#allocation7 + $0x174] ss:$8 sps:$4 sm:$0xff]   ;;  %v1167_v17 = vld [vmem:[#allocation7 + $0x70] ss:$8 sps:$4 sm:$0xff]  }
  0x58   : > { %v247_v3 = vsel %vm245_vm0, %v243_v1, 0.0  ;;  %v1165_v16 = vld [vmem:[#allocation7 + $0x74] ss:$8 sps:$4 sm:$0xff]   ;;  %v1170_v18 = vld [vmem:[#allocation7 + $0x164] ss:$8 sps:$4 sm:$0xff]   ;;  %822 = vmatprep.subr.bf16.mxu0 %v1164_v15  ;;  %s1081_s29 = sshll.u32 %s1475_s19, 7 }
  0x59   : > { %v248_v4 = vadd.f32 %v247_v3, %v246_v2  ;;  %v259_v10 = vsub.s32 %v256_v8, %v1594_v9  ;;  %781 = vmatprep.subr.bf16.mxu1 %v1165_v16  ;;  %v1171_v19 = vld [vmem:[#allocation7 + $0x64] ss:$8 sps:$4 sm:$0xff]   ;;  %v1168_v20 = vld [vmem:[#allocation7 + $0x160] ss:$8 sps:$4 sm:$0xff]   ;;  %v1176_v22 = vld [vmem:[#allocation7 + $0x154] ss:$8 sps:$4 sm:$0xff]   ;;  %s902_s13 = scalar_lea.hbm %s1660_s4, %s1081_s29 }
  0x5a   : > { %782 = vmatpush1.bf16.msra.mxu1 %v1167_v17  ;;  %v1173_v21 = vld [vmem:[#allocation7 + $0x60] ss:$8 sps:$4 sm:$0xff]   ;;  %v1177_v23 = vld [vmem:[#allocation7 + $0x54] ss:$8 sps:$4 sm:$0xff]   ;;  %v1174_v24 = vld [vmem:[#allocation7 + $0x150] ss:$8 sps:$4 sm:$0xff]  }
  0x5b   : > { %249 = vadd.xlane.f32.xlu0 %v248_v4  ;;  %783 = vmatprep.subr.bf16.mxu1 %v1171_v19  ;;  %v1179_v25 = vld [vmem:[#allocation7 + $0x50] ss:$8 sps:$4 sm:$0xff]   ;;  %v1182_v26 = vld [vmem:[#allocation7 + $0x144] ss:$8 sps:$4 sm:$0xff]   ;;  %v1180_v28 = vld [vmem:[#allocation7 + $0x140] ss:$8 sps:$4 sm:$0xff]  }
  0x5c   : > { %v1183_v27 = vld [vmem:[#allocation7 + $0x44] ss:$8 sps:$4 sm:$0xff]   ;;  %v1185_v29 = vld [vmem:[#allocation7 + $0x40] ss:$8 sps:$4 sm:$0xff]   ;;  %v1188_v30 = vld [vmem:[#allocation7 + $0x134] ss:$8 sps:$4 sm:$0xff]  }
  0x5d   : > { %v1189_v31 = vld [vmem:[#allocation7 + $0x34] ss:$8 sps:$4 sm:$0xff]   ;;  %v1186_v32 = vld [vmem:[#allocation7 + $0x130] ss:$8 sps:$4 sm:$0xff]   ;;  %v1194_v34 = vld [vmem:[#allocation7 + $0x124] ss:$8 sps:$4 sm:$0xff]  }
  0x5e   : > { %784 = vmatpush1.bf16.msra.mxu1 %v1173_v21  ;;  %v1191_v33 = vld [vmem:[#allocation7 + $0x30] ss:$8 sps:$4 sm:$0xff]   ;;  %v1195_v35 = vld [vmem:[#allocation7 + $0x24] ss:$8 sps:$4 sm:$0xff]   ;;  %v1192_v36 = vld [vmem:[#allocation7 + $0x120] ss:$8 sps:$4 sm:$0xff]  }
  0x5f   : > { %785 = vmatprep.subr.bf16.mxu1 %v1177_v23  ;;  %v1197_v37 = vld [vmem:[#allocation7 + $0x20] ss:$8 sps:$4 sm:$0xff]   ;;  %v1200_v38 = vld [vmem:[#allocation7 + $0x114] ss:$8 sps:$4 sm:$0xff]   ;;  %v1198_v40 = vld [vmem:[#allocation7 + $0x110] ss:$8 sps:$4 sm:$0xff]  }
  0x60   : > { %v1201_v39 = vld [vmem:[#allocation7 + $0x14] ss:$8 sps:$4 sm:$0xff]   ;;  %v1203_v41 = vld [vmem:[#allocation7 + $0x10] ss:$8 sps:$4 sm:$0xff]   ;;  %v1206_v42 = vld [vmem:[#allocation7 + $0x104] ss:$8 sps:$4 sm:$0xff]  }
  0x61   : > { %v1207_v43 = vld [vmem:[#allocation7 + $0x4] ss:$8 sps:$4 sm:$0xff]   ;;  %v1204_v44 = vld [vmem:[#allocation7 + $0x100] ss:$8 sps:$4 sm:$0xff]   ;;  %v1212_v46 = vld [vmem:[#allocation7 + $0x1f4] ss:$8 sps:$4 sm:$0xff]  }
  0x62   : > { %786 = vmatpush1.bf16.msra.mxu1 %v1179_v25  ;;  %v1209_v45 = vld [vmem:[#allocation7] ss:$8 sps:$4 sm:$0xff]   ;;  %v1213_v47 = vld [vmem:[#allocation7 + $0xf4] ss:$8 sps:$4 sm:$0xff]   ;;  %v1210_v48 = vld [vmem:[#allocation7 + $0x1f0] ss:$8 sps:$4 sm:$0xff]  }
  0x63   : > { %787 = vmatprep.subr.bf16.mxu1 %v1183_v27  ;;  %v1215_v49 = vld [vmem:[#allocation7 + $0xf0] ss:$8 sps:$4 sm:$0xff]   ;;  %v1218_v50 = vld [vmem:[#allocation7 + $0x1e4] ss:$8 sps:$4 sm:$0xff]   ;;  %v1216_v52 = vld [vmem:[#allocation7 + $0x1e0] ss:$8 sps:$4 sm:$0xff]  }
  0x64   : > { %v1219_v51 = vld [vmem:[#allocation7 + $0xe4] ss:$8 sps:$4 sm:$0xff]   ;;  %v1221_v53 = vld [vmem:[#allocation7 + $0xe0] ss:$8 sps:$4 sm:$0xff]   ;;  %v1224_v54 = vld [vmem:[#allocation7 + $0x1d4] ss:$8 sps:$4 sm:$0xff]  }
  0x65   : > { %v1222_v55 = vld [vmem:[#allocation7 + $0x1d0] ss:$8 sps:$4 sm:$0xff]   ;;  %v253_v56 = vld [vmem:[%s1658_s2] sm:$0x1]  ;;  %v1225_v63 = vld [vmem:[#allocation7 + $0xd4] ss:$8 sps:$4 sm:$0xff]  }
  0x66   : > { %788 = vmatpush1.bf16.msra.mxu1 %v1185_v29  ;;  %v1227_v1 = vld [vmem:[#allocation7 + $0xd0] ss:$8 sps:$4 sm:$0xff]   ;;  %v1230_v2 = vld [vmem:[#allocation7 + $0x1c4] ss:$8 sps:$4 sm:$0xff]   ;;  %v1228_v3 = vld [vmem:[#allocation7 + $0x1c0] ss:$8 sps:$4 sm:$0xff]  }
  0x67   : > { %789 = vmatprep.subr.bf16.mxu1 %v1189_v31  ;;  %v1231_v4 = vld [vmem:[#allocation7 + $0xc4] ss:$8 sps:$4 sm:$0xff]   ;;  %v1233_v5 = vld [vmem:[#allocation7 + $0xc0] ss:$8 sps:$4 sm:$0xff]   ;;  %v1236_v6 = vld [vmem:[#allocation7 + $0x1b4] ss:$8 sps:$4 sm:$0xff]  }
  0x68   : > { %v1234_v7 = vld [vmem:[#allocation7 + $0x1b0] ss:$8 sps:$4 sm:$0xff]   ;;  %v1601_v8 = vsub.s32 0, %v1594_v9  ;;  %v1245_v15 = vld [vmem:[#allocation7 + $0xa0] ss:$8 sps:$4 sm:$0xff]   ;;  %s240_s5 = scalar_lea.vmem [#allocation8], %s1002_s8 }
  0x69   : > { %v1248_v16 = vld [vmem:[#allocation7 + $0x194] ss:$8 sps:$4 sm:$0xff]   ;;  %v1254_v21 = vld [vmem:[#allocation7 + $0x184] ss:$8 sps:$4 sm:$0xff]   ;;  %v1257_v25 = vld [vmem:[#allocation7 + $0x80] ss:$8 sps:$4 sm:$0xff]  }
  0x6a   : > { %790 = vmatpush1.bf16.msra.mxu1 %v1191_v33  ;;  %v1255_v23 = vld [vmem:[#allocation7 + $0x84] ss:$8 sps:$4 sm:$0xff]   ;;  %s904_s6 = sshll.u32 %s240_s5, 4  ;;  %s890_s25 = scalar_lea.sflag [#allocation4], %s1572_s30  ;;  %s905_s6 = int_to_ptr.vmem [resolvable:$true] %s904_s6 }
  0x6b   : > { %791 = vmatprep.subr.bf16.mxu1 %v1195_v35  ;;  %s1350_s26 = scalar_lea.vmem %s905_s6, 128  ;;  %p1676_p0 = scmp.ne.s32.totalorder %s1670_s14, 0 }
  0x6c   : > { %p1351_p13 = scmp.ne.s32.totalorder %s905_s6, %s1350_s26  ;;  %s1428_s24 = smov [#allocation8]  }
  0x6d   : > { %s1354_s19 = sshll.u32 %s1428_s24, 4  ;;  %s1355_s19 = int_to_ptr.vmem [resolvable:$false] %s1354_s19 }
  0x6e   : > { %792 = vmatpush1.bf16.msra.mxu1 %v1197_v37  ;;  %p1352_p1 = pnand %p1351_p13, %p1676_p0  ;;  %s1356_s27 = scalar_lea.vmem %s1355_s19, 256 }
  0x6f   : > { %793 = vmatprep.subr.bf16.mxu1 %v1201_v39  ;;  %p1357_p4 = scmp.lt.s32.totalorder %s905_s6, %s1355_s19  ;;  %p1358_p6 = scmp.lt.s32.totalorder %s1356_s27, %s1350_s26 }
  0x70   : > { %p1353_p2 = pneg %p1352_p1 }
  0x71   : > { %p1359_p9 = por %p1358_p6, %p1357_p4 }
  0x72   : > { %794 = vmatpush1.bf16.msra.mxu1 %v1203_v41 }
  0x73   : > { %795 = vmatprep.subr.bf16.mxu1 %v1207_v43  ;;  %p1360_p12 = pnand %p1359_p9, %p1353_p2 }
  0x76   : > { %796 = vmatpush1.bf16.msra.mxu1 %v1209_v45 }
  0x77   : > { %797 = vmatprep.subr.bf16.mxu1 %v1213_v47 }
  0x7a   : > { %798 = vmatpush2.bf16.msra.mxu1 %v1215_v49 }
  0x7b   : > { %799 = vmatprep.subr.bf16.mxu1 %v1219_v51 }
  0x7e   : > { %800 = vmatpush2.bf16.msra.mxu1 %v1221_v53 }
  0x7f   : > { %801 = vmatprep.subr.bf16.mxu1 %v1225_v63 }
  0x82   : > { %802 = vmatpush2.bf16.msra.mxu1 %v1227_v1 }
  0x83   : > { %803 = vmatprep.subr.bf16.mxu1 %v1231_v4 }
  0x86   : > { %804 = vmatpush2.bf16.msra.mxu1 %v1233_v5 }
  0xe4   : > { %v250_v11 = vpop.xlane.xlu0 %249 }
  0xe5   : > { %v251_v12 = vmul.f32 0.00390625, %v250_v11  ;;  %v1239_v11 = vld [vmem:[#allocation7 + $0xb0] ss:$8 sps:$4 sm:$0xff]  }
  0xe7   : > { %v260_v13 = vrot.slane %v251_v12, %v259_v10  ;;  %v1237_v10 = vld [vmem:[#allocation7 + $0xb4] ss:$8 sps:$4 sm:$0xff]   ;;  %v1240_v12 = vld [vmem:[#allocation7 + $0x1a0] ss:$8 sps:$4 sm:$0xff]  }
  0xe8   : > { %805 = vmatprep.subr.bf16.mxu1 %v1237_v10 }
  0xe9   : > { %1087 = vmatmul.mubr.msk.f32.vlgmr.msra.gmra.mxu0 %vm261_vm2, %v260_v13  ;;  %v1242_v13 = vld [vmem:[#allocation7 + $0x1a4] ss:$8 sps:$4 sm:$0xff]   ;;  %806 = vmatpush2.bf16.msra.mxu1 %v1239_v11 }
  0xea   : > { %823 = vmatpush1.bf16.msra.mxu0 %v1162_v14  ;;  %v1243_v14 = vld [vmem:[#allocation7 + $0xa4] ss:$8 sps:$4 sm:$0xff]  }
  0xeb   : > { %824 = vmatprep.subr.bf16.mxu0 %v1170_v18  ;;  %807 = vmatprep.subr.bf16.mxu1 %v1243_v14  ;;  %v1249_v18 = vld [vmem:[#allocation7 + $0x94] ss:$8 sps:$4 sm:$0xff]  }
  0xed   : > { %808 = vmatpush2.bf16.msra.mxu1 %v1245_v15 }
  0xee   : > { %825 = vmatpush1.bf16.msra.mxu0 %v1168_v20  ;;  %v1246_v20 = vld [vmem:[#allocation7 + $0x190] ss:$8 sps:$4 sm:$0xff]   ;;  %809 = vmatprep.subr.bf16.mxu1 %v1249_v18 }
  0xef   : > { %826 = vmatprep.subr.bf16.mxu0 %v1176_v22  ;;  %v1251_v22 = vld [vmem:[#allocation7 + $0x90] ss:$8 sps:$4 sm:$0xff]  }
  0xf1   : > { %810 = vmatpush2.bf16.msra.mxu1 %v1251_v22 }
  0xf2   : > { %827 = vmatpush1.bf16.msra.mxu0 %v1174_v24  ;;  %v1252_v24 = vld [vmem:[#allocation7 + $0x180] ss:$8 sps:$4 sm:$0xff]   ;;  %811 = vmatprep.subr.bf16.mxu1 %v1255_v23 }
  0xf3   : > { %828 = vmatprep.subr.bf16.mxu0 %v1182_v26  ;;  %v1427_v26 = vmov 839922192  }
  0xf4   : > { %v352_v27 = vunpack.c.l.s4 %v1427_v26 }
  0xf5   : > { %812 = vmatpush2.bf16.msra.mxu1 %v1257_v25 }
  0xf6   : > { %829 = vmatpush1.bf16.msra.mxu0 %v1180_v28  ;;  %v353_v28 = vunpack.c.0.s8 %v352_v27 }
  0xf7   : > { %830 = vmatprep.subr.bf16.mxu0 %v1188_v30 }
  0xf8   : > { %v356_v29 = vsub.s32 %v353_v28, %v1594_v9 }
  0xfa   : > { %831 = vmatpush1.bf16.msra.mxu0 %v1186_v32 }
  0xfb   : > { %832 = vmatprep.subr.bf16.mxu0 %v1194_v34 }
  0xfe   : > { %833 = vmatpush1.bf16.msra.mxu0 %v1192_v36 }
  0xff   : > { %834 = vmatprep.subr.bf16.mxu0 %v1200_v38 }
 0x102   : > { %835 = vmatpush1.bf16.msra.mxu0 %v1198_v40 }
 0x103   : > { %836 = vmatprep.subr.bf16.mxu0 %v1206_v42 }
 0x106   : > { %837 = vmatpush1.bf16.msra.mxu0 %v1204_v44 }
 0x107   : > { %838 = vmatprep.subr.bf16.mxu0 %v1212_v46 }
 0x10a   : > { %839 = vmatpush2.bf16.msra.mxu0 %v1210_v48 }
 0x10b   : > { %840 = vmatprep.subr.bf16.mxu0 %v1218_v50 }
 0x10e   : > { %841 = vmatpush2.bf16.msra.mxu0 %v1216_v52 }
 0x10f   : > { %842 = vmatprep.subr.bf16.mxu0 %v1224_v54 }
 0x112   : > { %843 = vmatpush2.bf16.msra.mxu0 %v1222_v55 }
 0x113   : > { %844 = vmatprep.subr.bf16.mxu0 %v1230_v2 }
 0x116   : > { %845 = vmatpush2.bf16.msra.mxu0 %v1228_v3 }
 0x117   : > { %846 = vmatprep.subr.bf16.mxu0 %v1236_v6 }
 0x11a   : > { %847 = vmatpush2.bf16.msra.mxu0 %v1234_v7 }
 0x11b   : > { %848 = vmatprep.subr.bf16.mxu0 %v1242_v13 }
 0x11e   : > { %849 = vmatpush2.bf16.msra.mxu0 %v1240_v12 }
 0x11f   : > { %850 = vmatprep.subr.bf16.mxu0 %v1248_v16 }
 0x122   : > { %851 = vmatpush2.bf16.msra.mxu0 %v1246_v20 }
 0x123   : > { %852 = vmatprep.subr.bf16.mxu0 %v1254_v21 }
 0x126   : > { %853 = vmatpush2.bf16.msra.mxu0 %v1252_v24 }
 0x1a9   : > { %v333_v57 = vpop.f32.mrf.mxu0 }
 0x1aa   : > { %v334_v58 = vadd.f32 %v333_v57, %v253_v56 }
 0x1ab   : > { %v1088_v59 = vpop.f32.mrf.mxu0 }
 0x1ac   : > { %v1008_v60 = vmul.f32 -1.442695, %v334_v58 }
 0x1ae   : > { %1258 = vpow2.f32 %v1008_v60 }
 0x1bb   : > { %v1259_v61 = vpop.eup %1258 }
 0x1bc   : > { %v340_v62 = vadd.f32 1.0, %v1259_v61 }
 0x1be   : > { %1260 = vrcp.f32 %v340_v62 }
 0x1cb   : > { %v1261_v17 = vpop.eup %1260 }
 0x1cc   : > { %v346_v19 = vrot.slane %v1261_v17, %v1601_v8 }
 0x1ce   : > { %348 = vbcast.lane.b32.xlu0 %v346_v19, 256 }
 0x240   : > { %v349_v30 = vpop.permute.xlu0 %348 }
 0x241   : > { %v357_v31 = vrot.slane %v349_v30, %v356_v29 }
 0x243   : > { %v1606_v32 = vmul.f32 %v357_v31, %v1586_v0 }
 0x245   : > { %v361_v33 = vcombine.high %v1606_v32, %v1606_v32  ;;  %v379_v34 = vsel %vm245_vm0, %v1606_v32, -inf  ;;  %v363_v35 = vsel %vm245_vm0, %v1606_v32, 0.0 }
 0x246   : > { %v380_v36 = vrot.slane %v379_v34, 4  ;;  %v364_v37 = vrot.slane %v363_v35, 4 }
 0x247   : > { %v386_v38 = vsel %vm245_vm0, %v361_v33, -inf  ;;  %v370_v9 = vsel %vm245_vm0, %v361_v33, 0.0 }
 0x248   : > { %v381_v39 = vmax.f32 %v379_v34, %v380_v36  ;;  %v387_v40 = vrot.slane %v386_v38, 4  ;;  %v371_v41 = vrot.slane %v370_v9, 4  ;;  %v365_v0 = vadd.f32 %v364_v37, %v363_v35 }
 0x24a   : > { %v388_v42 = vmax.f32 %v386_v38, %v387_v40  ;;  %v382_v43 = vrot.slane %v381_v39, 2  ;;  %v372_v44 = vadd.f32 %v371_v41, %v370_v9  ;;  %v366_v45 = vrot.slane %v365_v0, 2 }
 0x24c   : > { %v389_v46 = vrot.slane %v388_v42, 2  ;;  %v383_v47 = vmax.f32 %v381_v39, %v382_v43  ;;  %v373_v48 = vrot.slane %v372_v44, 2  ;;  %v367_v49 = vadd.f32 %v366_v45, %v365_v0 }
 0x24e   : > { %v390_v50 = vmax.f32 %v388_v42, %v389_v46  ;;  %v384_v51 = vrot.slane %v383_v47, 1  ;;  %v374_v52 = vadd.f32 %v373_v48, %v372_v44  ;;  %v368_v53 = vrot.slane %v367_v49, 1 }
 0x250   : > { %v391_v54 = vrot.slane %v390_v50, 1  ;;  %v375_v55 = vrot.slane %v374_v52, 1  ;;  %v369_v56 = vadd.f32 %v368_v53, %v367_v49  ;;  %v385_v57 = vmax.f32 %v383_v47, %v384_v51 }
 0x252   : > { %v392_v58 = vmax.f32 %v390_v50, %v391_v54  ;;  %v376_v59 = vadd.f32 %v375_v55, %v374_v52  ;;  %v377_v60 = vmul.f32 0.25, %v369_v56  ;;  %v395_v63 = vpack.c.bf16 %v385_v57, %v385_v57 }
 0x254   : > { %v396_v61 = vpack.c.bf16 %v392_v58, %v392_v58  ;;  %v378_v62 = vmul.f32 0.25, %v376_v59  ;;  %v393_v2 = vpack.c.bf16 %v377_v60, %v377_v60 }
 0x256   : > { %854 = vmatprep.mubr.bf16.mxu0 %v396_v61  ;;  %v394_v1 = vpack.c.bf16 %v378_v62, %v378_v62 }
 0x257   : > { %855 = vmatmul.mubr.bf16.vlgmr.msra.gmra.mxu0 %v395_v63 }
 0x258   : > { %813 = vmatprep.mubr.bf16.mxu1 %v394_v1 }
 0x259   : > { %814 = vmatmul.mubr.bf16.vlgmr.msra.gmra.mxu1 %v393_v2 }
 0x317   : > { %v856_v3 = vpop.f32.mrf.mxu0 }
 0x319   : > { %v815_v4 = vpop.f32.mrf.mxu1  ;;  %v858_v5 = vpop.f32.mrf.mxu0 }
 0x31a   : > { %v857_v6 = vadd.f32 %v856_v3, %v815_v4 }
 0x31b   : > { %v817_v7 = vpop.f32.mrf.mxu1  ;;  %v860_v10 = vpop.f32.mrf.mxu0 }
 0x31c   : > { %v1073_v11 = vmul.f32 -1.442695, %v857_v6  ;;  %v859_v12 = vadd.f32 %v858_v5, %v817_v7 }
 0x31d   : > { %v819_v13 = vpop.f32.mrf.mxu1  ;;  %v861_v14 = vpop.f32.mrf.mxu0 }
 0x31e   : > { %1262 = vpow2.f32 %v1073_v11  ;;  %v1074_v15 = vmul.f32 -1.442695, %v859_v12 }
 0x31f   : > { %v820_v16 = vpop.f32.mrf.mxu1 }
 0x320   : > { %1264 = vpow2.f32 %v1074_v15 }
 0x32b   : > { %v1263_v17 = vpop.eup %1262 }
 0x32c   : > { %v869_v18 = vadd.f32 1.0, %v1263_v17 }
 0x32d   : > { %v1265_v19 = vpop.eup %1264 }
 0x32e   : > { %1266 = vrcp.f32 %v869_v18  ;;  %v870_v20 = vadd.f32 1.0, %v1265_v19 }
 0x330   : > { %1268 = vrcp.f32 %v870_v20 }
 0x33b   : > { %v1267_v21 = vpop.eup %1266 }
 0x33c   : > { %v878_v23 = vrot.slane %v1267_v21, %v1601_v8 }
 0x33d   : > { %v1269_v22 = vpop.eup %1268 }
 0x33e   : > { %v882_v24 = vrot.slane %v1269_v22, %v1601_v8 }
 0x340   : > { %v885_v25 = vcombine.low %v878_v23, %v882_v24 }
 0x342   : > { %v887_v26 = vmul.f32 %v885_v25, %v1606_v32 }
 0x344   : > { %888 = vst [vmem:[%s240_s5] sm:$0xff] %v887_v26 }
 0x345   : > { %1363 = shalt.err (!%p1360_p12)
}
 0x346   : > { %s1364_s28 = scalar_lea.hbm %s902_s13, 128  ;;  %s1368_s9 = scalar_lea.hbm %s1660_s4, 256 }
 0x347   : > { %p1365_p3 = scmp.ne.s32.totalorder %s902_s13, %s1364_s28  ;;  %p1369_p5 = scmp.lt.s32.totalorder %s902_s13, %s1660_s4 }
 0x348   : > { %p1370_p8 = scmp.lt.s32.totalorder %s1368_s9, %s1364_s28 }
 0x349   : > { %p1366_p7 = pnand %p1365_p3, %p1676_p0 }
 0x34a   : > { %p1371_p11 = por %p1370_p8, %p1369_p5 }
 0x34b   : > { %p1367_p10 = pneg %p1366_p7 }
 0x34d   : > { %p1372_p13 = pnand %p1371_p11, %p1367_p10 }
 0x34f   : > { %1375 = shalt.err (!%p1372_p13)
}
 0x350   : > { %1099 = dma.vmem_to_hbm [thread:$0]  (%p1676_p0), %s905_s6, 128, %s902_s13, %s890_s25  }
 0x351 PF: > { %s916_s23 = sand.u32 1, %s1406_s15   ;;  %p1677_p1 = scmp.ne.s32.totalorder %s1666_s22, 0 }
 0x352   : > { %p1678_p2 = scmp.ge.s32.totalorder %s1418_s18, 2  ;;  %s917_s29 = scalar_lea.sflag [#allocation4], %s916_s23 }
 0x354   : > { %p1113_p4 = pnand %p1678_p2, %p1677_p1 }
 0x356   : > { %p1114_p6 = pneg %p1113_p4 }
 0x358   : > { %1401 = dma.done.wait (%p1114_p6), %s917_s29, 128  }
 0x359   : > { %1403 = vsyncadd (%p1114_p6), %s917_s29, 4294967168  ;;  %p18_p9 = scmp.ge.s32.totalorder %s1526_s11, 4   ;;  %s1679_s15 = smov %s1410_s16 }
 0x35a   : > { %s1680_s16 = smov %s1414_s17  ;;  %s1681_s17 = smov %s1542_s20 }
 0x35b   : > { %s1682_s18 = smov %s1526_s11  ;;  %20 = sbr.rel (!%p18_p9) target bundleno = 6 (0x6), region = 89 }
 0x360   :  { %922 = vsyncpa [#allocation3], 1 }
 0x361   :  { %924 = vsyncpa [#allocation3 + $0x1], 1 }
 0x362   :  { %925 = vsyncpa [#allocation6], 1 }
 0x363   :  { %926 = vsyncpa [#allocation4], 1 }
 0x364   :  { %928 = vsyncpa [#allocation4 + $0x1], 1 }

// kernel: tpu_custom_call.1
= control target key start
LH: loop header
LB: loop body
LE: loop exit
PB: predicated region body
PF: predicated region fallthrough
CT: control target
= control target key end

     0   :  { %9 = vsyncpa [#allocation3], 0  ;;  %s1656_s0 = inlined_call_operand.hbm [shape: f32[2,4,256], index: 0, kind: input, shape index: {}]   ;;  %s1657_s1 = inlined_call_operand.hbm [shape: f32[4,4], index: 1, kind: input, shape index: {}]   ;;  %s1658_s2 = inlined_call_operand.vmem [shape: f32[1,4], index: 2, kind: input, shape index: {}]   ;;  %s1659_s3 = inlined_call_operand.hbm [shape: bf16[512,256], index: 3, kind: input, shape index: {}]   ;;  %s1660_s4 = inlined_call_operand.hbm [shape: f32[2,4,256], index: 4, kind: output, shape index: {}]  }
   0x1   :  { %11 = vsyncpa [#allocation3 + $0x1], 0 }
   0x2   :  { %12 = vsyncpa [#allocation6], 0 }
   0x3   :  { %13 = vsyncpa [#allocation4], 0 }
   0x4   :  { %15 = vsyncpa [#allocation4 + $0x1], 0  ;;  %s1454_s15 = smov 0   ;;  %s1456_s16 = smov 0  }
   0x5   :  { %s1458_s17 = smov 0   ;;  %s1460_s18 = smov 0  }
   0x6 LB: > { %s1475_s19 = sadd.s32 4294967295, %s1418_s18   ;;  %s993_s20 = sadd.s32 4294967294, %s1418_s18   ;;  %s1418_s18 = sphi %s1460_s18, %s1682_s18   ;;  %s1414_s17 = sphi %s1458_s17, %s1681_s17   ;;  %s1410_s16 = sphi %s1456_s16, %s1680_s16   ;;  %s1406_s15 = sphi %s1454_s15, %s1679_s15  }
   0x7   : > { %p41_p0 = scmp.ne.s32.totalorder %s1410_s16, %s1406_s15  ;;  %p1661_p1 = scmp.eq.s32.totalorder %s1475_s19, 0 }
   0x8   : > { %p134_p3 = scmp.eq.s32.totalorder %s993_s20, 1  ;;  %p994_p5 = scmp.ge.s32.totalorder %s1418_s18, 1 }
   0x9   : > { %p1484_p4 = por %p1661_p1, %p41_p0  ;;  %p141_p7 = scmp.lt.s32.totalorder %s1418_s18, 3 }
   0xa   : > { %p1489_p6 = por %p134_p3, %p41_p0  ;;  %s1420_s24 = smov [#allocation5]  }
   0xb   : > { %s1665_s21 = scalar_select %p1484_p4, 1, 0 }
   0xc   : > { %s1666_s22 = scalar_select %p1489_p6, 1, 0 }
   0xd   : > { %p1494_p8 = pnand %p994_p5, %p141_p7  ;;  %s154_s25 = sshll.u32 %s1420_s24, 4  ;;  %s155_s25 = int_to_ptr.vmem [resolvable:$true] %s154_s25 }
   0xe   : > { %s1421_s26 = smov [#allocation7]   ;;  %s1281_s29 = scalar_lea.vmem %s155_s25, 64 }
   0xf   : > { %s1667_s23 = scalar_select %p1494_p8, 1, 0 }
  0x10   : > { %p1101_p10 = pneg %p1494_p8  ;;  %s167_s27 = sshll.u32 %s1421_s26, 4  ;;  %s168_s27 = int_to_ptr.vmem [resolvable:$true] %s167_s27 }
  0x11   : > { %p1282_p13 = scmp.ne.s32.totalorder %s155_s25, %s1281_s29  ;;  %p1289_p5 = scmp.lt.s32.totalorder %s155_s25, %s155_s25 }
  0x12   : > { %p1503_p11 = pnand %p1101_p10, %p1661_p1  ;;  %p1290_p7 = scmp.lt.s32.totalorder %s1281_s29, %s1281_s29 }
  0x14   : > { %p1272_p12 = pneg %p1503_p11  ;;  %p1291_p9 = por %p1290_p7, %p1289_p5 }
  0x16   : > { %p1284_p0 = pnand %p1282_p13, %p1272_p12 }
  0x18   : > { %p1285_p3 = pneg %p1284_p0 }
  0x1a   : > { %p1292_p2 = pnand %p1291_p9, %p1285_p3 }
  0x1c   : > { %1295 = shalt.err (!%p1292_p2)
}
  0x1d   : > { %1104 = dma.hbm_to_vmem [thread:$0]  (!%p1503_p11), %s1657_s1, 64, %s155_s25, [#allocation6]  }
  0x1e   : > { %s1307_s6 = scalar_lea.vmem %s168_s27, 8192  ;;  %p1315_p13 = scmp.lt.s32.totalorder %s168_s27, %s168_s27 }
  0x1f   : > { %p1308_p10 = scmp.ne.s32.totalorder %s168_s27, %s1307_s6  ;;  %p1316_p0 = scmp.lt.s32.totalorder %s1307_s6, %s1307_s6 }
  0x21   : > { %p1310_p1 = pnand %p1308_p10, %p1272_p12  ;;  %p1317_p4 = por %p1316_p0, %p1315_p13 }
  0x23   : > { %p1311_p6 = pneg %p1310_p1 }
  0x25   : > { %p1318_p8 = pnand %p1317_p4, %p1311_p6 }
  0x27   : > { %1321 = shalt.err (!%p1318_p8)
}
  0x28   : > { %s1422_s7 = smov 128   ;;  %s1423_s8 = smov 8  }
  0x29   : > { %1107 = dma.hbm_to_vmem [thread:$0]  (!%p1503_p11), %s1659_s3, 8192, %s168_s27, [#allocation6], %s1422_s7, %s1422_s7, %s1423_s8  }
  0x2a   : > { %s1526_s11 = sadd.s32 1, %s1418_s18   ;;  %s28_s12 = sadd.s32 1, %s1414_s17 }
  0x2b   : > { %s25_s13 = ssub.s32 %s1418_s18, %s1526_s11  ;;  %p35_p1 = scmp.ne.s32.totalorder %s1414_s17, %s1410_s16 }
  0x2c   : > { %p26_p2 = scmp.eq.s32.totalorder %s25_s13, 0  ;;  %p36_p4 = scmp.eq.s32.totalorder %s1418_s18, 0 }
  0x2d   : > { %p1669_p6 = scmp.eq.s32.totalorder %s1475_s19, 1  ;;  %p1118_p9 = scmp.lt.s32.totalorder %s1418_s18, 2 }
  0x2e   : > { %s1542_s20 = scalar_select %p26_p2, %s1414_s17, %s28_s12  }
  0x2f   : > { %p1536_p8 = por %p1669_p6, %p35_p1  ;;  %p37_p12 = por %p36_p4, %p35_p1 }
  0x30   : > { %s181_s24 = sand.u32 1, %s1414_s17   ;;  %s1080_s26 = sshll.u32 %s1418_s18, 7 }
  0x31   : > { %s1670_s14 = scalar_select %p1536_p8, 1, 0 }
  0x32   : > { %s998_s25 = sshll.u32 %s181_s24, 3  ;;  %s1549_s29 = scalar_lea.hbm %s1656_s0, %s1080_s26 }
  0x33   : > { %s185_s30 = scalar_lea.vmem [#allocation2], %s998_s25  ;;  %p1551_p11 = pnand %p1118_p9, %p37_p12 }
  0x34   : > { %s193_s5 = sshll.u32 %s185_s30, 4  ;;  %s182_s7 = scalar_lea.sflag [#allocation3], %s181_s24  ;;  %s194_s5 = int_to_ptr.vmem [resolvable:$true] %s193_s5 }
  0x35   : > { %s1322_s8 = scalar_lea.hbm %s1549_s29, 128  ;;  %p1324_p5 = pneg %p1551_p11 }
  0x36   : > { %p1323_p3 = scmp.ne.s32.totalorder %s1549_s29, %s1322_s8  ;;  %s1327_s12 = scalar_lea.hbm %s1656_s0, 256 }
  0x37   : > { %p1328_p13 = scmp.lt.s32.totalorder %s1549_s29, %s1656_s0  ;;  %p1329_p0 = scmp.lt.s32.totalorder %s1327_s12, %s1322_s8 }
  0x38   : > { %p1325_p7 = pnand %p1324_p5, %p1323_p3 }
  0x39   : > { %p1330_p1 = por %p1329_p0, %p1328_p13 }
  0x3a   : > { %p1326_p10 = pneg %p1325_p7 }
  0x3c   : > { %p1331_p2 = pnand %p1330_p1, %p1326_p10 }
  0x3e   : > { %1334 = shalt.err (!%p1331_p2)
}
  0x3f   : > { %s1335_s26 = scalar_lea.vmem %s194_s5, 128  ;;  %s1424_s24 = smov [#allocation2]  }
  0x40   : > { %p1336_p4 = scmp.ne.s32.totalorder %s194_s5, %s1335_s26  ;;  %s1340_s27 = sshll.u32 %s1424_s24, 4  ;;  %s1341_s27 = int_to_ptr.vmem [resolvable:$false] %s1340_s27 }
  0x41   : > { %s1342_s28 = scalar_lea.vmem %s1341_s27, 256  ;;  %p1343_p12 = scmp.lt.s32.totalorder %s194_s5, %s1341_s27 }
  0x42   : > { %p1338_p6 = pnand %p1336_p4, %p1324_p5  ;;  %p1344_p3 = scmp.lt.s32.totalorder %s1342_s28, %s1335_s26 }
  0x44   : > { %p1339_p9 = pneg %p1338_p6  ;;  %p1345_p7 = por %p1344_p3, %p1343_p12 }
  0x46   : > { %p1346_p8 = pnand %p1345_p7, %p1339_p9 }
  0x48   : > { %1349 = shalt.err (!%p1346_p8)
}
  0x49   : > { %1111 = dma.hbm_to_vmem [thread:$0]  (!%p1551_p11), %s1549_s29, 128, %s194_s5, %s182_s7  }
  0x4a   : > { %p1672_p10 = scmp.ne.s32.totalorder %s1667_s23, 0 }
  0x4b   : > { %s1572_s30 = sand.u32 (!%p1672_p10), 1, %s1410_s16   ;;  %p1673_p5 = scmp.ne.s32.totalorder (!%p1672_p10), %s1665_s21, 0 }
  0x4c   : > { %202 = sbr.rel (%p1672_p10) target bundleno = 849 (0x351), region = 36  ;;  %s1002_s8 = sshll.u32 (!%p1672_p10), %s1572_s30, 3 }
  0x4d   : > { %s205_s9 = scalar_lea.sflag (!%p1672_p10), [#allocation3], %s1572_s30  ;;  %s208_s10 = scalar_lea.vmem (!%p1672_p10), [#allocation2], %s1002_s8 }
  0x51   : > { %1393 = dma.done.wait (%p1673_p5), %s205_s9, 128  }
  0x52   : > { %1395 = vsyncadd (%p1673_p5), %s205_s9, 4294967168  ;;  %p1674_p8 = scmp.eq.s32.totalorder %s1475_s19, 0 }
  0x54   : > { %1397 = dma.done.wait (%p1674_p8), [#allocation6], 8256   ;;  %p1675_p11 = pmov %p1674_p8 }
  0x55   : > { %vm245_vm0 = vcmask 1043456   ;;  %v1586_v0 = vld [vmem:[%s208_s10] sm:$0xff]  ;;  %v1425_v5 = vmov 0.0   ;;  %v252_v6 = vld [vmem:[#allocation5] sm:$0xf]  ;;  %vm1426_vm1 = vmmov 0   ;;  %v255_v7 = vlaneseq }
  0x56   : > { %1399 = vsyncadd (%p1675_p11), [#allocation6], 4294959040  ;;  %v243_v1 = vcombine.high %v1586_v0, %v1586_v0  ;;  %v246_v2 = vsel %vm245_vm0, %v1586_v0, 0.0  ;;  %1084 = vmatprep.subr.mxu0 %v1425_v5  ;;  %1086 = vmatprep.mubr.msk.f32.mxu0 %vm1426_vm1, %v1425_v5  ;;  %vm261_vm2 = vcmask 31744   ;;  %v1162_v14 = vld [vmem:[#allocation7 + $0x170] ss:$8 sps:$4 sm:$0xff]  }
  0x57   : > { %1085 = vmatpush3.msk.msra.mxu0 %vm245_vm0, %v252_v6  ;;  %v256_v8 = vand.u32 127, %v255_v7  ;;  %v1594_v9 = vshrl.u32 %v255_v7, 7  ;;  %v1164_v15 = vld [vmem:[#allocation7 + $0x174] ss:$8 sps:$4 sm:$0xff]   ;;  %v1167_v17 = vld [vmem:[#allocation7 + $0x70] ss:$8 sps:$4 sm:$0xff]  }
  0x58   : > { %v247_v3 = vsel %vm245_vm0, %v243_v1, 0.0  ;;  %v1165_v16 = vld [vmem:[#allocation7 + $0x74] ss:$8 sps:$4 sm:$0xff]   ;;  %v1170_v18 = vld [vmem:[#allocation7 + $0x164] ss:$8 sps:$4 sm:$0xff]   ;;  %822 = vmatprep.subr.bf16.mxu0 %v1164_v15  ;;  %s1081_s29 = sshll.u32 %s1475_s19, 7 }
  0x59   : > { %v248_v4 = vadd.f32 %v247_v3, %v246_v2  ;;  %v259_v10 = vsub.s32 %v256_v8, %v1594_v9  ;;  %781 = vmatprep.subr.bf16.mxu1 %v1165_v16  ;;  %v1171_v19 = vld [vmem:[#allocation7 + $0x64] ss:$8 sps:$4 sm:$0xff]   ;;  %v1168_v20 = vld [vmem:[#allocation7 + $0x160] ss:$8 sps:$4 sm:$0xff]   ;;  %v1176_v22 = vld [vmem:[#allocation7 + $0x154] ss:$8 sps:$4 sm:$0xff]   ;;  %s902_s13 = scalar_lea.hbm %s1660_s4, %s1081_s29 }
  0x5a   : > { %782 = vmatpush1.bf16.msra.mxu1 %v1167_v17  ;;  %v1173_v21 = vld [vmem:[#allocation7 + $0x60] ss:$8 sps:$4 sm:$0xff]   ;;  %v1177_v23 = vld [vmem:[#allocation7 + $0x54] ss:$8 sps:$4 sm:$0xff]   ;;  %v1174_v24 = vld [vmem:[#allocation7 + $0x150] ss:$8 sps:$4 sm:$0xff]  }
  0x5b   : > { %249 = vadd.xlane.f32.xlu0 %v248_v4  ;;  %783 = vmatprep.subr.bf16.mxu1 %v1171_v19  ;;  %v1179_v25 = vld [vmem:[#allocation7 + $0x50] ss:$8 sps:$4 sm:$0xff]   ;;  %v1182_v26 = vld [vmem:[#allocation7 + $0x144] ss:$8 sps:$4 sm:$0xff]   ;;  %v1180_v28 = vld [vmem:[#allocation7 + $0x140] ss:$8 sps:$4 sm:$0xff]  }
  0x5c   : > { %v1183_v27 = vld [vmem:[#allocation7 + $0x44] ss:$8 sps:$4 sm:$0xff]   ;;  %v1185_v29 = vld [vmem:[#allocation7 + $0x40] ss:$8 sps:$4 sm:$0xff]   ;;  %v1188_v30 = vld [vmem:[#allocation7 + $0x134] ss:$8 sps:$4 sm:$0xff]  }
  0x5d   : > { %v1189_v31 = vld [vmem:[#allocation7 + $0x34] ss:$8 sps:$4 sm:$0xff]   ;;  %v1186_v32 = vld [vmem:[#allocation7 + $0x130] ss:$8 sps:$4 sm:$0xff]   ;;  %v1194_v34 = vld [vmem:[#allocation7 + $0x124] ss:$8 sps:$4 sm:$0xff]  }
  0x5e   : > { %784 = vmatpush1.bf16.msra.mxu1 %v1173_v21  ;;  %v1191_v33 = vld [vmem:[#allocation7 + $0x30] ss:$8 sps:$4 sm:$0xff]   ;;  %v1195_v35 = vld [vmem:[#allocation7 + $0x24] ss:$8 sps:$4 sm:$0xff]   ;;  %v1192_v36 = vld [vmem:[#allocation7 + $0x120] ss:$8 sps:$4 sm:$0xff]  }
  0x5f   : > { %785 = vmatprep.subr.bf16.mxu1 %v1177_v23  ;;  %v1197_v37 = vld [vmem:[#allocation7 + $0x20] ss:$8 sps:$4 sm:$0xff]   ;;  %v1200_v38 = vld [vmem:[#allocation7 + $0x114] ss:$8 sps:$4 sm:$0xff]   ;;  %v1198_v40 = vld [vmem:[#allocation7 + $0x110] ss:$8 sps:$4 sm:$0xff]  }
  0x60   : > { %v1201_v39 = vld [vmem:[#allocation7 + $0x14] ss:$8 sps:$4 sm:$0xff]   ;;  %v1203_v41 = vld [vmem:[#allocation7 + $0x10] ss:$8 sps:$4 sm:$0xff]   ;;  %v1206_v42 = vld [vmem:[#allocation7 + $0x104] ss:$8 sps:$4 sm:$0xff]  }
  0x61   : > { %v1207_v43 = vld [vmem:[#allocation7 + $0x4] ss:$8 sps:$4 sm:$0xff]   ;;  %v1204_v44 = vld [vmem:[#allocation7 + $0x100] ss:$8 sps:$4 sm:$0xff]   ;;  %v1212_v46 = vld [vmem:[#allocation7 + $0x1f4] ss:$8 sps:$4 sm:$0xff]  }
  0x62   : > { %786 = vmatpush1.bf16.msra.mxu1 %v1179_v25  ;;  %v1209_v45 = vld [vmem:[#allocation7] ss:$8 sps:$4 sm:$0xff]   ;;  %v1213_v47 = vld [vmem:[#allocation7 + $0xf4] ss:$8 sps:$4 sm:$0xff]   ;;  %v1210_v48 = vld [vmem:[#allocation7 + $0x1f0] ss:$8 sps:$4 sm:$0xff]  }
  0x63   : > { %787 = vmatprep.subr.bf16.mxu1 %v1183_v27  ;;  %v1215_v49 = vld [vmem:[#allocation7 + $0xf0] ss:$8 sps:$4 sm:$0xff]   ;;  %v1218_v50 = vld [vmem:[#allocation7 + $0x1e4] ss:$8 sps:$4 sm:$0xff]   ;;  %v1216_v52 = vld [vmem:[#allocation7 + $0x1e0] ss:$8 sps:$4 sm:$0xff]  }
  0x64   : > { %v1219_v51 = vld [vmem:[#allocation7 + $0xe4] ss:$8 sps:$4 sm:$0xff]   ;;  %v1221_v53 = vld [vmem:[#allocation7 + $0xe0] ss:$8 sps:$4 sm:$0xff]   ;;  %v1224_v54 = vld [vmem:[#allocation7 + $0x1d4] ss:$8 sps:$4 sm:$0xff]  }
  0x65   : > { %v1222_v55 = vld [vmem:[#allocation7 + $0x1d0] ss:$8 sps:$4 sm:$0xff]   ;;  %v253_v56 = vld [vmem:[%s1658_s2] sm:$0x1]  ;;  %v1225_v63 = vld [vmem:[#allocation7 + $0xd4] ss:$8 sps:$4 sm:$0xff]  }
  0x66   : > { %788 = vmatpush1.bf16.msra.mxu1 %v1185_v29  ;;  %v1227_v1 = vld [vmem:[#allocation7 + $0xd0] ss:$8 sps:$4 sm:$0xff]   ;;  %v1230_v2 = vld [vmem:[#allocation7 + $0x1c4] ss:$8 sps:$4 sm:$0xff]   ;;  %v1228_v3 = vld [vmem:[#allocation7 + $0x1c0] ss:$8 sps:$4 sm:$0xff]  }
  0x67   : > { %789 = vmatprep.subr.bf16.mxu1 %v1189_v31  ;;  %v1231_v4 = vld [vmem:[#allocation7 + $0xc4] ss:$8 sps:$4 sm:$0xff]   ;;  %v1233_v5 = vld [vmem:[#allocation7 + $0xc0] ss:$8 sps:$4 sm:$0xff]   ;;  %v1236_v6 = vld [vmem:[#allocation7 + $0x1b4] ss:$8 sps:$4 sm:$0xff]  }
  0x68   : > { %v1234_v7 = vld [vmem:[#allocation7 + $0x1b0] ss:$8 sps:$4 sm:$0xff]   ;;  %v1601_v8 = vsub.s32 0, %v1594_v9  ;;  %v1245_v15 = vld [vmem:[#allocation7 + $0xa0] ss:$8 sps:$4 sm:$0xff]   ;;  %s240_s5 = scalar_lea.vmem [#allocation8], %s1002_s8 }
  0x69   : > { %v1248_v16 = vld [vmem:[#allocation7 + $0x194] ss:$8 sps:$4 sm:$0xff]   ;;  %v1254_v21 = vld [vmem:[#allocation7 + $0x184] ss:$8 sps:$4 sm:$0xff]   ;;  %v1257_v25 = vld [vmem:[#allocation7 + $0x80] ss:$8 sps:$4 sm:$0xff]  }
  0x6a   : > { %790 = vmatpush1.bf16.msra.mxu1 %v1191_v33  ;;  %v1255_v23 = vld [vmem:[#allocation7 + $0x84] ss:$8 sps:$4 sm:$0xff]   ;;  %s904_s6 = sshll.u32 %s240_s5, 4  ;;  %s890_s25 = scalar_lea.sflag [#allocation4], %s1572_s30  ;;  %s905_s6 = int_to_ptr.vmem [resolvable:$true] %s904_s6 }
  0x6b   : > { %791 = vmatprep.subr.bf16.mxu1 %v1195_v35  ;;  %s1350_s26 = scalar_lea.vmem %s905_s6, 128  ;;  %p1676_p0 = scmp.ne.s32.totalorder %s1670_s14, 0 }
  0x6c   : > { %p1351_p13 = scmp.ne.s32.totalorder %s905_s6, %s1350_s26  ;;  %s1428_s24 = smov [#allocation8]  }
  0x6d   : > { %s1354_s19 = sshll.u32 %s1428_s24, 4  ;;  %s1355_s19 = int_to_ptr.vmem [resolvable:$false] %s1354_s19 }
  0x6e   : > { %792 = vmatpush1.bf16.msra.mxu1 %v1197_v37  ;;  %p1352_p1 = pnand %p1351_p13, %p1676_p0  ;;  %s1356_s27 = scalar_lea.vmem %s1355_s19, 256 }
  0x6f   : > { %793 = vmatprep.subr.bf16.mxu1 %v1201_v39  ;;  %p1357_p4 = scmp.lt.s32.totalorder %s905_s6, %s1355_s19  ;;  %p1358_p6 = scmp.lt.s32.totalorder %s1356_s27, %s1350_s26 }
  0x70   : > { %p1353_p2 = pneg %p1352_p1 }
  0x71   : > { %p1359_p9 = por %p1358_p6, %p1357_p4 }
  0x72   : > { %794 = vmatpush1.bf16.msra.mxu1 %v1203_v41 }
  0x73   : > { %795 = vmatprep.subr.bf16.mxu1 %v1207_v43  ;;  %p1360_p12 = pnand %p1359_p9, %p1353_p2 }
  0x76   : > { %796 = vmatpush1.bf16.msra.mxu1 %v1209_v45 }
  0x77   : > { %797 = vmatprep.subr.bf16.mxu1 %v1213_v47 }
  0x7a   : > { %798 = vmatpush2.bf16.msra.mxu1 %v1215_v49 }
  0x7b   : > { %799 = vmatprep.subr.bf16.mxu1 %v1219_v51 }
  0x7e   : > { %800 = vmatpush2.bf16.msra.mxu1 %v1221_v53 }
  0x7f   : > { %801 = vmatprep.subr.bf16.mxu1 %v1225_v63 }
  0x82   : > { %802 = vmatpush2.bf16.msra.mxu1 %v1227_v1 }
  0x83   : > { %803 = vmatprep.subr.bf16.mxu1 %v1231_v4 }
  0x86   : > { %804 = vmatpush2.bf16.msra.mxu1 %v1233_v5 }
  0xe4   : > { %v250_v11 = vpop.xlane.xlu0 %249 }
  0xe5   : > { %v251_v12 = vmul.f32 0.00390625, %v250_v11  ;;  %v1239_v11 = vld [vmem:[#allocation7 + $0xb0] ss:$8 sps:$4 sm:$0xff]  }
  0xe7   : > { %v260_v13 = vrot.slane %v251_v12, %v259_v10  ;;  %v1237_v10 = vld [vmem:[#allocation7 + $0xb4] ss:$8 sps:$4 sm:$0xff]   ;;  %v1240_v12 = vld [vmem:[#allocation7 + $0x1a0] ss:$8 sps:$4 sm:$0xff]  }
  0xe8   : > { %805 = vmatprep.subr.bf16.mxu1 %v1237_v10 }
  0xe9   : > { %1087 = vmatmul.mubr.msk.f32.vlgmr.msra.gmra.mxu0 %vm261_vm2, %v260_v13  ;;  %v1242_v13 = vld [vmem:[#allocation7 + $0x1a4] ss:$8 sps:$4 sm:$0xff]   ;;  %806 = vmatpush2.bf16.msra.mxu1 %v1239_v11 }
  0xea   : > { %823 = vmatpush1.bf16.msra.mxu0 %v1162_v14  ;;  %v1243_v14 = vld [vmem:[#allocation7 + $0xa4] ss:$8 sps:$4 sm:$0xff]  }
  0xeb   : > { %824 = vmatprep.subr.bf16.mxu0 %v1170_v18  ;;  %807 = vmatprep.subr.bf16.mxu1 %v1243_v14  ;;  %v1249_v18 = vld [vmem:[#allocation7 + $0x94] ss:$8 sps:$4 sm:$0xff]  }
  0xed   : > { %808 = vmatpush2.bf16.msra.mxu1 %v1245_v15 }
  0xee   : > { %825 = vmatpush1.bf16.msra.mxu0 %v1168_v20  ;;  %v1246_v20 = vld [vmem:[#allocation7 + $0x190] ss:$8 sps:$4 sm:$0xff]   ;;  %809 = vmatprep.subr.bf16.mxu1 %v1249_v18 }
  0xef   : > { %826 = vmatprep.subr.bf16.mxu0 %v1176_v22  ;;  %v1251_v22 = vld [vmem:[#allocation7 + $0x90] ss:$8 sps:$4 sm:$0xff]  }
  0xf1   : > { %810 = vmatpush2.bf16.msra.mxu1 %v1251_v22 }
  0xf2   : > { %827 = vmatpush1.bf16.msra.mxu0 %v1174_v24  ;;  %v1252_v24 = vld [vmem:[#allocation7 + $0x180] ss:$8 sps:$4 sm:$0xff]   ;;  %811 = vmatprep.subr.bf16.mxu1 %v1255_v23 }
  0xf3   : > { %828 = vmatprep.subr.bf16.mxu0 %v1182_v26  ;;  %v1427_v26 = vmov 839922192  }
  0xf4   : > { %v352_v27 = vunpack.c.l.s4 %v1427_v26 }
  0xf5   : > { %812 = vmatpush2.bf16.msra.mxu1 %v1257_v25 }
  0xf6   : > { %829 = vmatpush1.bf16.msra.mxu0 %v1180_v28  ;;  %v353_v28 = vunpack.c.0.s8 %v352_v27 }
  0xf7   : > { %830 = vmatprep.subr.bf16.mxu0 %v1188_v30 }
  0xf8   : > { %v356_v29 = vsub.s32 %v353_v28, %v1594_v9 }
  0xfa   : > { %831 = vmatpush1.bf16.msra.mxu0 %v1186_v32 }
  0xfb   : > { %832 = vmatprep.subr.bf16.mxu0 %v1194_v34 }
  0xfe   : > { %833 = vmatpush1.bf16.msra.mxu0 %v1192_v36 }
  0xff   : > { %834 = vmatprep.subr.bf16.mxu0 %v1200_v38 }
 0x102   : > { %835 = vmatpush1.bf16.msra.mxu0 %v1198_v40 }
 0x103   : > { %836 = vmatprep.subr.bf16.mxu0 %v1206_v42 }
 0x106   : > { %837 = vmatpush1.bf16.msra.mxu0 %v1204_v44 }
 0x107   : > { %838 = vmatprep.subr.bf16.mxu0 %v1212_v46 }
 0x10a   : > { %839 = vmatpush2.bf16.msra.mxu0 %v1210_v48 }
 0x10b   : > { %840 = vmatprep.subr.bf16.mxu0 %v1218_v50 }
 0x10e   : > { %841 = vmatpush2.bf16.msra.mxu0 %v1216_v52 }
 0x10f   : > { %842 = vmatprep.subr.bf16.mxu0 %v1224_v54 }
 0x112   : > { %843 = vmatpush2.bf16.msra.mxu0 %v1222_v55 }
 0x113   : > { %844 = vmatprep.subr.bf16.mxu0 %v1230_v2 }
 0x116   : > { %845 = vmatpush2.bf16.msra.mxu0 %v1228_v3 }
 0x117   : > { %846 = vmatprep.subr.bf16.mxu0 %v1236_v6 }
 0x11a   : > { %847 = vmatpush2.bf16.msra.mxu0 %v1234_v7 }
 0x11b   : > { %848 = vmatprep.subr.bf16.mxu0 %v1242_v13 }
 0x11e   : > { %849 = vmatpush2.bf16.msra.mxu0 %v1240_v12 }
 0x11f   : > { %850 = vmatprep.subr.bf16.mxu0 %v1248_v16 }
 0x122   : > { %851 = vmatpush2.bf16.msra.mxu0 %v1246_v20 }
 0x123   : > { %852 = vmatprep.subr.bf16.mxu0 %v1254_v21 }
 0x126   : > { %853 = vmatpush2.bf16.msra.mxu0 %v1252_v24 }
 0x1a9   : > { %v333_v57 = vpop.f32.mrf.mxu0 }
 0x1aa   : > { %v334_v58 = vadd.f32 %v333_v57, %v253_v56 }
 0x1ab   : > { %v1088_v59 = vpop.f32.mrf.mxu0 }
 0x1ac   : > { %v1008_v60 = vmul.f32 -1.442695, %v334_v58 }
 0x1ae   : > { %1258 = vpow2.f32 %v1008_v60 }
 0x1bb   : > { %v1259_v61 = vpop.eup %1258 }
 0x1bc   : > { %v340_v62 = vadd.f32 1.0, %v1259_v61 }
 0x1be   : > { %1260 = vrcp.f32 %v340_v62 }
 0x1cb   : > { %v1261_v17 = vpop.eup %1260 }
 0x1cc   : > { %v346_v19 = vrot.slane %v1261_v17, %v1601_v8 }
 0x1ce   : > { %348 = vbcast.lane.b32.xlu0 %v346_v19, 256 }
 0x240   : > { %v349_v30 = vpop.permute.xlu0 %348 }
 0x241   : > { %v357_v31 = vrot.slane %v349_v30, %v356_v29 }
 0x243   : > { %v1606_v32 = vmul.f32 %v357_v31, %v1586_v0 }
 0x245   : > { %v361_v33 = vcombine.high %v1606_v32, %v1606_v32  ;;  %v379_v34 = vsel %vm245_vm0, %v1606_v32, -inf  ;;  %v363_v35 = vsel %vm245_vm0, %v1606_v32, 0.0 }
 0x246   : > { %v380_v36 = vrot.slane %v379_v34, 4  ;;  %v364_v37 = vrot.slane %v363_v35, 4 }
 0x247   : > { %v386_v38 = vsel %vm245_vm0, %v361_v33, -inf  ;;  %v370_v9 = vsel %vm245_vm0, %v361_v33, 0.0 }
 0x248   : > { %v381_v39 = vmax.f32 %v379_v34, %v380_v36  ;;  %v387_v40 = vrot.slane %v386_v38, 4  ;;  %v371_v41 = vrot.slane %v370_v9, 4  ;;  %v365_v0 = vadd.f32 %v364_v37, %v363_v35 }
 0x24a   : > { %v388_v42 = vmax.f32 %v386_v38, %v387_v40  ;;  %v382_v43 = vrot.slane %v381_v39, 2  ;;  %v372_v44 = vadd.f32 %v371_v41, %v370_v9  ;;  %v366_v45 = vrot.slane %v365_v0, 2 }
 0x24c   : > { %v389_v46 = vrot.slane %v388_v42, 2  ;;  %v383_v47 = vmax.f32 %v381_v39, %v382_v43  ;;  %v373_v48 = vrot.slane %v372_v44, 2  ;;  %v367_v49 = vadd.f32 %v366_v45, %v365_v0 }
 0x24e   : > { %v390_v50 = vmax.f32 %v388_v42, %v389_v46  ;;  %v384_v51 = vrot.slane %v383_v47, 1  ;;  %v374_v52 = vadd.f32 %v373_v48, %v372_v44  ;;  %v368_v53 = vrot.slane %v367_v49, 1 }
 0x250   : > { %v391_v54 = vrot.slane %v390_v50, 1  ;;  %v375_v55 = vrot.slane %v374_v52, 1  ;;  %v369_v56 = vadd.f32 %v368_v53, %v367_v49  ;;  %v385_v57 = vmax.f32 %v383_v47, %v384_v51 }
 0x252   : > { %v392_v58 = vmax.f32 %v390_v50, %v391_v54  ;;  %v376_v59 = vadd.f32 %v375_v55, %v374_v52  ;;  %v377_v60 = vmul.f32 0.25, %v369_v56  ;;  %v395_v63 = vpack.c.bf16 %v385_v57, %v385_v57 }
 0x254   : > { %v396_v61 = vpack.c.bf16 %v392_v58, %v392_v58  ;;  %v378_v62 = vmul.f32 0.25, %v376_v59  ;;  %v393_v2 = vpack.c.bf16 %v377_v60, %v377_v60 }
 0x256   : > { %854 = vmatprep.mubr.bf16.mxu0 %v396_v61  ;;  %v394_v1 = vpack.c.bf16 %v378_v62, %v378_v62 }
 0x257   : > { %855 = vmatmul.mubr.bf16.vlgmr.msra.gmra.mxu0 %v395_v63 }
 0x258   : > { %813 = vmatprep.mubr.bf16.mxu1 %v394_v1 }
 0x259   : > { %814 = vmatmul.mubr.bf16.vlgmr.msra.gmra.mxu1 %v393_v2 }
 0x317   : > { %v856_v3 = vpop.f32.mrf.mxu0 }
 0x319   : > { %v815_v4 = vpop.f32.mrf.mxu1  ;;  %v858_v5 = vpop.f32.mrf.mxu0 }
 0x31a   : > { %v857_v6 = vadd.f32 %v856_v3, %v815_v4 }
 0x31b   : > { %v817_v7 = vpop.f32.mrf.mxu1  ;;  %v860_v10 = vpop.f32.mrf.mxu0 }
 0x31c   : > { %v1073_v11 = vmul.f32 -1.442695, %v857_v6  ;;  %v859_v12 = vadd.f32 %v858_v5, %v817_v7 }
 0x31d   : > { %v819_v13 = vpop.f32.mrf.mxu1  ;;  %v861_v14 = vpop.f32.mrf.mxu0 }
 0x31e   : > { %1262 = vpow2.f32 %v1073_v11  ;;  %v1074_v15 = vmul.f32 -1.442695, %v859_v12 }
 0x31f   : > { %v820_v16 = vpop.f32.mrf.mxu1 }
 0x320   : > { %1264 = vpow2.f32 %v1074_v15 }
 0x32b   : > { %v1263_v17 = vpop.eup %1262 }
 0x32c   : > { %v869_v18 = vadd.f32 1.0, %v1263_v17 }
 0x32d   : > { %v1265_v19 = vpop.eup %1264 }
 0x32e   : > { %1266 = vrcp.f32 %v869_v18  ;;  %v870_v20 = vadd.f32 1.0, %v1265_v19 }
 0x330   : > { %1268 = vrcp.f32 %v870_v20 }
 0x33b   : > { %v1267_v21 = vpop.eup %1266 }
 0x33c   : > { %v878_v23 = vrot.slane %v1267_v21, %v1601_v8 }
 0x33d   : > { %v1269_v22 = vpop.eup %1268 }
 0x33e   : > { %v882_v24 = vrot.slane %v1269_v22, %v1601_v8 }
 0x340   : > { %v885_v25 = vcombine.low %v878_v23, %v882_v24 }
 0x342   : > { %v887_v26 = vmul.f32 %v885_v25, %v1606_v32 }
 0x344   : > { %888 = vst [vmem:[%s240_s5] sm:$0xff] %v887_v26 }
 0x345   : > { %1363 = shalt.err (!%p1360_p12)
}
 0x346   : > { %s1364_s28 = scalar_lea.hbm %s902_s13, 128  ;;  %s1368_s9 = scalar_lea.hbm %s1660_s4, 256 }
 0x347   : > { %p1365_p3 = scmp.ne.s32.totalorder %s902_s13, %s1364_s28  ;;  %p1369_p5 = scmp.lt.s32.totalorder %s902_s13, %s1660_s4 }
 0x348   : > { %p1370_p8 = scmp.lt.s32.totalorder %s1368_s9, %s1364_s28 }
 0x349   : > { %p1366_p7 = pnand %p1365_p3, %p1676_p0 }
 0x34a   : > { %p1371_p11 = por %p1370_p8, %p1369_p5 }
 0x34b   : > { %p1367_p10 = pneg %p1366_p7 }
 0x34d   : > { %p1372_p13 = pnand %p1371_p11, %p1367_p10 }
 0x34f   : > { %1375 = shalt.err (!%p1372_p13)
}
 0x350   : > { %1099 = dma.vmem_to_hbm [thread:$0]  (%p1676_p0), %s905_s6, 128, %s902_s13, %s890_s25  }
 0x351 PF: > { %s916_s23 = sand.u32 1, %s1406_s15   ;;  %p1677_p1 = scmp.ne.s32.totalorder %s1666_s22, 0 }
 0x352   : > { %p1678_p2 = scmp.ge.s32.totalorder %s1418_s18, 2  ;;  %s917_s29 = scalar_lea.sflag [#allocation4], %s916_s23 }
 0x354   : > { %p1113_p4 = pnand %p1678_p2, %p1677_p1 }
 0x356   : > { %p1114_p6 = pneg %p1113_p4 }
 0x358   : > { %1401 = dma.done.wait (%p1114_p6), %s917_s29, 128  }
 0x359   : > { %1403 = vsyncadd (%p1114_p6), %s917_s29, 4294967168  ;;  %p18_p9 = scmp.ge.s32.totalorder %s1526_s11, 4   ;;  %s1679_s15 = smov %s1410_s16 }
 0x35a   : > { %s1680_s16 = smov %s1414_s17  ;;  %s1681_s17 = smov %s1542_s20 }
 0x35b   : > { %s1682_s18 = smov %s1526_s11  ;;  %20 = sbr.rel (!%p18_p9) target bundleno = 6 (0x6), region = 89 }
 0x360   :  { %922 = vsyncpa [#allocation3], 1 }
 0x361   :  { %924 = vsyncpa [#allocation3 + $0x1], 1 }
 0x362   :  { %925 = vsyncpa [#allocation6], 1 }
 0x363   :  { %926 = vsyncpa [#allocation4], 1 }
 0x364   :  { %928 = vsyncpa [#allocation4 + $0x1], 1 }

</bundles_post_ra>
